<compile_context>
chip_gen: v7x
topology: tpu7x:2x2x1
jax: 0.10.0
libtpu: 0.0.40
codegen_flags: <defaults>
</compile_context>

<pallas_src>
import functools

import jax
import jax.numpy as jnp
from jax.experimental import pallas as pl
from jax.experimental.pallas import tpu as pltpu


# --------------------------------------------------------------------------
# Fused MHSA kernel: one grid step per block of batch elements.
#   x_ref    : (Bblk, T, dim)   input tokens for this batch block
#   wqkv_ref : (dim, 3*H*dh)    bf16 qkv weight, columns ordered (q|k|v, head,
#                               dh), softmax scale pre-folded into the q cols
#   w0_ref   : (H*dh, dim)      bf16 output projection (rows h-major, d-minor)
#   o_ref    : (Bblk, T, dim)
# --------------------------------------------------------------------------
def mhsa_kernel(x_ref, wqkv_ref, w0_ref, o_ref, *, heads, dim_head):
    bblk, seq, dim = x_ref.shape
    hd = heads * dim_head
    rows = bblk * seq

    # bf16 operands on the MXU, fp32 accumulation everywhere.
    x = x_ref[...].reshape(rows, dim).astype(jnp.bfloat16)
    wqkv = wqkv_ref[...]                       # (dim, 3*hd)  bf16
    w0 = w0_ref[...]                           # (hd, dim)    bf16

    # One wide MXU matmul yields q, k, v for every head at once.
    qkv = jnp.dot(x, wqkv, preferred_element_type=jnp.float32)      # (rows, 3*hd) f32

    acc = jnp.zeros((rows, dim), jnp.float32)
    for h in range(heads):                     # static unroll (small H)
        lo = h * dim_head
        hi = lo + dim_head
        # (rows, dh) column slices -> (Bblk, T, dh); leading-dim reshape is free.
        q = qkv[:, lo:hi].reshape(bblk, seq, dim_head).astype(jnp.bfloat16)
        k = qkv[:, hd + lo:hd + hi].reshape(bblk, seq, dim_head).astype(jnp.bfloat16)
        v = qkv[:, 2 * hd + lo:2 * hd + hi].reshape(bblk, seq, dim_head).astype(jnp.bfloat16)

        # Per-batch-element scores; the softmax scale is already folded into
        # the q weight columns, so no (T, T) scaling here.
        s = jnp.einsum('bid,bjd->bij', q, k,
                       preferred_element_type=jnp.float32)          # (Bblk, T, T) f32

        # Numerically-stable softmax in fp32, normalization deferred past PV.
        m = jnp.max(s, axis=-1, keepdims=True)
        e = jnp.exp(s - m)
        denom = jnp.sum(e, axis=-1, keepdims=True)

        o_h = jnp.einsum('bij,bjd->bid', e.astype(jnp.bfloat16), v,
                         preferred_element_type=jnp.float32)        # (Bblk, T, dh)
        o_h = o_h * pl.reciprocal(denom, approx=True)               # EUP, ~free

        # head-concat + W_0 fused as an accumulation of per-head projections.
        acc = acc + jnp.dot(o_h.reshape(rows, dim_head).astype(jnp.bfloat16),
                            w0[lo:hi, :],
                            preferred_element_type=jnp.float32)     # (rows, dim)

    o_ref[...] = acc.reshape(bblk, seq, dim).astype(o_ref.dtype)


# --------------------------------------------------------------------------
# One-time weight preparation (hoisted out of the per-call wrapper).
# --------------------------------------------------------------------------
def prepare_mhsa_weights(w_qkv, w_0, heads, dim_head, param_dtype=jnp.bfloat16):
    """Permute qkv columns '(d k h)' -> '(k h d)', fold the softmax scale into
    the q columns, transpose W_0, and cast both to bf16 for the MXU."""
    dim = w_qkv.shape[1]
    hd = heads * dim_head
    scale = float(dim_head) ** -0.5

    wt = jnp.transpose(w_qkv)                                   # (dim, 3*hd), cols (d,k,h)
    wt = jnp.transpose(
        wt.reshape(dim, dim_head, 3, heads), (0, 2, 3, 1)
    ).reshape(dim, 3 * hd)                                      # cols ordered (k, h, d)
    wt = wt.at[:, :hd].multiply(scale)                          # fold scale into q cols

    w0t = jnp.transpose(w_0)                                    # (hd, dim), rows (h, d)
    return wt.astype(param_dtype), w0t.astype(param_dtype)


def _pick_batch_block(B, T, target_rows=512):
    """Largest divisor of B whose block has <= ~target_rows query rows."""
    best = 1
    for d in range(1, B + 1):
        if B % d == 0 and d * T <= max(T, target_rows):
            best = d
    return best


# --------------------------------------------------------------------------
# Wrapper: one fused pallas_call; grid over batch blocks, weights resident.
# --------------------------------------------------------------------------
def multi_head_self_attention(x, w_perm, w0t, heads, dim_head, batch_block=None):
    B, T, dim = x.shape
    hd = heads * dim_head
    assert w_perm.shape == (dim, 3 * hd)
    assert w0t.shape == (hd, dim)

    if batch_block is None:
        batch_block = _pick_batch_block(B, T)
    assert B % batch_block == 0

    kernel = functools.partial(mhsa_kernel, heads=heads, dim_head=dim_head)

    return pl.pallas_call(
        kernel,
        out_shape=jax.ShapeDtypeStruct((B, T, dim), x.dtype),
        grid_spec=pltpu.PrefetchScalarGridSpec(
            num_scalar_prefetch=0,
            grid=(B // batch_block,),
            in_specs=[
                pl.BlockSpec((batch_block, T, dim), lambda b: (b, 0, 0)),
                pl.BlockSpec((dim, 3 * hd), lambda b: (0, 0)),   # resident weight
                pl.BlockSpec((hd, dim), lambda b: (0, 0)),       # resident weight
            ],
            out_specs=pl.BlockSpec((batch_block, T, dim), lambda b: (b, 0, 0)),
        ),
        compiler_params=pltpu.CompilerParams(
            dimension_semantics=("parallel",)),
    )(x, w_perm, w0t)


# --------------------------------------------------------------------------
# Deterministic parameter init (PyTorch nn.Linear default, bias=False) +
# one-time prepared kernel weights.
# --------------------------------------------------------------------------
def init_mhsa_params(key, dim, heads, dim_head=None):
    dim_head = dim // heads if dim_head is None else dim_head
    hd = heads * dim_head
    k1, k2 = jax.random.split(key)
    b_qkv = 1.0 / (dim ** 0.5)
    b_0 = 1.0 / (hd ** 0.5)
    w_qkv = jax.random.uniform(k1, (3 * hd, dim), jnp.float32, -b_qkv, b_qkv)
    w_0 = jax.random.uniform(k2, (dim, hd), jnp.float32, -b_0, b_0)
    w_perm, w0t = prepare_mhsa_weights(w_qkv, w_0, heads, dim_head)
    return {"w_qkv": w_qkv, "w_0": w_0, "w_perm": w_perm, "w0t": w0t,
            "heads": heads, "dim_head": dim_head}


# --------------------------------------------------------------------------
# Pure-JAX fp32 reference (mirrors the PyTorch module exactly).
# --------------------------------------------------------------------------
def ref_mhsa(x, w_qkv, w_0, heads, dim_head):
    B, T, dim = x.shape
    qkv = x @ jnp.transpose(w_qkv)                          # (B, T, 3*hd)
    qkv = qkv.reshape(B, T, dim_head, 3, heads)             # (b, t, d, k, h)
    qkv = jnp.transpose(qkv, (3, 0, 4, 1, 2))               # (k, b, h, t, d)
    q, k, v = qkv[0], qkv[1], qkv[2]
    scale = float(dim_head) ** -0.5
    s = jnp.einsum('bhid,bhjd->bhij', q, k) * scale
    p = jax.nn.softmax(s, axis=-1)
    o = jnp.einsum('bhij,bhjd->bhid', p, v)                 # (b, h, t, d)
    o = jnp.transpose(o, (0, 2, 1, 3)).reshape(B, T, heads * dim_head)
    return o @ jnp.transpose(w_0)


if __name__ == "__main__":
    key = jax.random.PRNGKey(0)
    k_x, k_p = jax.random.split(key)

    B, T, dim, heads = 2, 8, 32, 8                          # dim_head = 4
    x = jax.random.normal(k_x, (B, T, dim), jnp.float32)

    params = init_mhsa_params(k_p, dim, heads)

    out = multi_head_self_attention(
        x, params["w_perm"], params["w0t"], params["heads"], params["dim_head"])
    out = jax.block_until_ready(out)

    ref = jax.block_until_ready(
        ref_mhsa(x, params["w_qkv"], params["w_0"],
                 params["heads"], params["dim_head"]))

    assert out.shape == (B, T, dim), out.shape
    # bf16 MXU operands + approx reciprocal => loosened tolerance vs fp32 ref.
    max_err = float(jnp.max(jnp.abs(out - ref)))
    assert jnp.allclose(out, ref, atol=3e-2, rtol=3e-2), max_err

    print("KERNEL_OK")
</pallas_src>

<mosaic_0001>
module attributes {stable_mosaic.version = 11 : i64} {
  func.func @mhsa_kernel(%arg0: i32, %arg1: memref<2x8x32xf32, #tpu.memory_space<vmem>>, %arg2: memref<32x96xbf16, #tpu.memory_space<vmem>>, %arg3: memref<32x32xbf16, #tpu.memory_space<vmem>>, %arg4: memref<2x8x32xf32, #tpu.memory_space<vmem>>) attributes {dimension_semantics = [#tpu.dimension_semantics<parallel>], iteration_bounds = array<i64: 1>, scalar_prefetch = 0 : i64, scratch_operands = 0 : i64, tpu.core_type = #tpu.core_type<tc>, window_params = [{transform_indices = @transform_0, window_bounds = array<i64: 2, 8, 32>}, {pipeline_mode = #tpu.pipeline_mode<synchronous>, transform_indices = @transform_1, window_bounds = array<i64: 32, 96>}, {pipeline_mode = #tpu.pipeline_mode<synchronous>, transform_indices = @transform_2, window_bounds = array<i64: 32, 32>}, {transform_indices = @transform_3, window_bounds = array<i64: 2, 8, 32>}]} {
    %c0 = arith.constant 0 : index
    %c0_0 = arith.constant 0 : index
    %c0_1 = arith.constant 0 : index
    %0 = vector.load %arg1[%c0, %c0_0, %c0_1] : memref<2x8x32xf32, #tpu.memory_space<vmem>>, vector<2x8x32xf32>
    %1 = vector.shape_cast %0 : vector<2x8x32xf32> to vector<16x32xf32>
    %2 = arith.truncf %1 : vector<16x32xf32> to vector<16x32xbf16>
    %c0_2 = arith.constant 0 : index
    %c0_3 = arith.constant 0 : index
    %3 = vector.load %arg2[%c0_2, %c0_3] : memref<32x96xbf16, #tpu.memory_space<vmem>>, vector<32x96xbf16>
    %c0_4 = arith.constant 0 : index
    %c0_5 = arith.constant 0 : index
    %4 = vector.load %arg3[%c0_4, %c0_5] : memref<32x32xbf16, #tpu.memory_space<vmem>>, vector<32x32xbf16>
    %cst = arith.constant dense<0.000000e+00> : vector<16x96xf32>
    %5 = tpu.matmul %2, %3, %cst {dimension_numbers = #tpu.dot_dimension_numbers<[1], [0], [0], [1], [0, 0, 1, 1], [], []>} : vector<16x32xbf16>, vector<32x96xbf16>, vector<16x96xf32> -> vector<16x96xf32>
    %cst_6 = arith.constant 0.000000e+00 : f32
    %6 = vector.broadcast %cst_6 : f32 to vector<16x32xf32>
    %7 = vector.extract_strided_slice %5 {offsets = [0, 0], sizes = [16, 4], strides = [1, 1]} : vector<16x96xf32> to vector<16x4xf32>
    %8 = vector.shape_cast %7 : vector<16x4xf32> to vector<2x8x4xf32>
    %9 = arith.truncf %8 : vector<2x8x4xf32> to vector<2x8x4xbf16>
    %10 = vector.extract_strided_slice %5 {offsets = [0, 32], sizes = [16, 4], strides = [1, 1]} : vector<16x96xf32> to vector<16x4xf32>
    %11 = vector.shape_cast %10 : vector<16x4xf32> to vector<2x8x4xf32>
    %12 = arith.truncf %11 : vector<2x8x4xf32> to vector<2x8x4xbf16>
    %13 = vector.extract_strided_slice %5 {offsets = [0, 64], sizes = [16, 4], strides = [1, 1]} : vector<16x96xf32> to vector<16x4xf32>
    %14 = vector.shape_cast %13 : vector<16x4xf32> to vector<2x8x4xf32>
    %15 = arith.truncf %14 : vector<2x8x4xf32> to vector<2x8x4xbf16>
    "tpu.trace_start"() <{level = 10 : i32, message = "bid,bjd->bij"}> : () -> ()
    %cst_7 = arith.constant dense<0.000000e+00> : vector<2x8x8xf32>
    %16 = tpu.matmul %9, %12, %cst_7 {dimension_numbers = #tpu.dot_dimension_numbers<[2], [2], [1], [1], [0, 0, 0, 1, 1, 1], [0], [0]>} : vector<2x8x4xbf16>, vector<2x8x4xbf16>, vector<2x8x8xf32> -> vector<2x8x8xf32>
    "tpu.trace_stop"() : () -> ()
    %cst_8 = arith.constant dense<0xFF800000> : vector<2x8xf32>
    %17 = vector.multi_reduction <maximumf>, %16, %cst_8 [2] : vector<2x8x8xf32> to vector<2x8xf32>
    %18 = vector.shape_cast %17 : vector<2x8xf32> to vector<2x8x1xf32>
    %19 = vector.broadcast %18 : vector<2x8x1xf32> to vector<2x8x8xf32>
    %20 = arith.subf %16, %19 : vector<2x8x8xf32>
    %21 = math.exp %20 : vector<2x8x8xf32>
    %cst_9 = arith.constant dense<0.000000e+00> : vector<2x8xf32>
    %22 = vector.multi_reduction <add>, %21, %cst_9 [2] : vector<2x8x8xf32> to vector<2x8xf32>
    %23 = vector.shape_cast %22 : vector<2x8xf32> to vector<2x8x1xf32>
    %24 = arith.truncf %21 : vector<2x8x8xf32> to vector<2x8x8xbf16>
    "tpu.trace_start"() <{level = 10 : i32, message = "bij,bjd->bid"}> : () -> ()
    %cst_10 = arith.constant dense<0.000000e+00> : vector<2x8x4xf32>
    %25 = tpu.matmul %24, %15, %cst_10 {dimension_numbers = #tpu.dot_dimension_numbers<[2], [1], [1], [2], [0, 0, 0, 1, 1, 2], [0], [0]>} : vector<2x8x8xbf16>, vector<2x8x4xbf16>, vector<2x8x4xf32> -> vector<2x8x4xf32>
    "tpu.trace_stop"() : () -> ()
    %26 = tpu.reciprocal %23 {approx = true} : vector<2x8x1xf32> -> vector<2x8x1xf32>
    %27 = vector.broadcast %26 : vector<2x8x1xf32> to vector<2x8x4xf32>
    %28 = arith.mulf %25, %27 : vector<2x8x4xf32>
    %29 = vector.shape_cast %28 : vector<2x8x4xf32> to vector<16x4xf32>
    %30 = arith.truncf %29 : vector<16x4xf32> to vector<16x4xbf16>
    %31 = vector.extract_strided_slice %4 {offsets = [0, 0], sizes = [4, 32], strides = [1, 1]} : vector<32x32xbf16> to vector<4x32xbf16>
    %cst_11 = arith.constant dense<0.000000e+00> : vector<16x32xf32>
    %32 = tpu.matmul %30, %31, %cst_11 {dimension_numbers = #tpu.dot_dimension_numbers<[1], [0], [0], [1], [0, 0, 1, 1], [], []>} : vector<16x4xbf16>, vector<4x32xbf16>, vector<16x32xf32> -> vector<16x32xf32>
    %33 = arith.addf %6, %32 : vector<16x32xf32>
    %34 = vector.extract_strided_slice %5 {offsets = [0, 4], sizes = [16, 4], strides = [1, 1]} : vector<16x96xf32> to vector<16x4xf32>
    %35 = vector.shape_cast %34 : vector<16x4xf32> to vector<2x8x4xf32>
    %36 = arith.truncf %35 : vector<2x8x4xf32> to vector<2x8x4xbf16>
    %37 = vector.extract_strided_slice %5 {offsets = [0, 36], sizes = [16, 4], strides = [1, 1]} : vector<16x96xf32> to vector<16x4xf32>
    %38 = vector.shape_cast %37 : vector<16x4xf32> to vector<2x8x4xf32>
    %39 = arith.truncf %38 : vector<2x8x4xf32> to vector<2x8x4xbf16>
    %40 = vector.extract_strided_slice %5 {offsets = [0, 68], sizes = [16, 4], strides = [1, 1]} : vector<16x96xf32> to vector<16x4xf32>
    %41 = vector.shape_cast %40 : vector<16x4xf32> to vector<2x8x4xf32>
    %42 = arith.truncf %41 : vector<2x8x4xf32> to vector<2x8x4xbf16>
    "tpu.trace_start"() <{level = 10 : i32, message = "bid,bjd->bij"}> : () -> ()
    %cst_12 = arith.constant dense<0.000000e+00> : vector<2x8x8xf32>
    %43 = tpu.matmul %36, %39, %cst_12 {dimension_numbers = #tpu.dot_dimension_numbers<[2], [2], [1], [1], [0, 0, 0, 1, 1, 1], [0], [0]>} : vector<2x8x4xbf16>, vector<2x8x4xbf16>, vector<2x8x8xf32> -> vector<2x8x8xf32>
    "tpu.trace_stop"() : () -> ()
    %cst_13 = arith.constant dense<0xFF800000> : vector<2x8xf32>
    %44 = vector.multi_reduction <maximumf>, %43, %cst_13 [2] : vector<2x8x8xf32> to vector<2x8xf32>
    %45 = vector.shape_cast %44 : vector<2x8xf32> to vector<2x8x1xf32>
    %46 = vector.broadcast %45 : vector<2x8x1xf32> to vector<2x8x8xf32>
    %47 = arith.subf %43, %46 : vector<2x8x8xf32>
    %48 = math.exp %47 : vector<2x8x8xf32>
    %cst_14 = arith.constant dense<0.000000e+00> : vector<2x8xf32>
    %49 = vector.multi_reduction <add>, %48, %cst_14 [2] : vector<2x8x8xf32> to vector<2x8xf32>
    %50 = vector.shape_cast %49 : vector<2x8xf32> to vector<2x8x1xf32>
    %51 = arith.truncf %48 : vector<2x8x8xf32> to vector<2x8x8xbf16>
    "tpu.trace_start"() <{level = 10 : i32, message = "bij,bjd->bid"}> : () -> ()
    %cst_15 = arith.constant dense<0.000000e+00> : vector<2x8x4xf32>
    %52 = tpu.matmul %51, %42, %cst_15 {dimension_numbers = #tpu.dot_dimension_numbers<[2], [1], [1], [2], [0, 0, 0, 1, 1, 2], [0], [0]>} : vector<2x8x8xbf16>, vector<2x8x4xbf16>, vector<2x8x4xf32> -> vector<2x8x4xf32>
    "tpu.trace_stop"() : () -> ()
    %53 = tpu.reciprocal %50 {approx = true} : vector<2x8x1xf32> -> vector<2x8x1xf32>
    %54 = vector.broadcast %53 : vector<2x8x1xf32> to vector<2x8x4xf32>
    %55 = arith.mulf %52, %54 : vector<2x8x4xf32>
    %56 = vector.shape_cast %55 : vector<2x8x4xf32> to vector<16x4xf32>
    %57 = arith.truncf %56 : vector<16x4xf32> to vector<16x4xbf16>
    %58 = vector.extract_strided_slice %4 {offsets = [4, 0], sizes = [4, 32], strides = [1, 1]} : vector<32x32xbf16> to vector<4x32xbf16>
    %cst_16 = arith.constant dense<0.000000e+00> : vector<16x32xf32>
    %59 = tpu.matmul %57, %58, %cst_16 {dimension_numbers = #tpu.dot_dimension_numbers<[1], [0], [0], [1], [0, 0, 1, 1], [], []>} : vector<16x4xbf16>, vector<4x32xbf16>, vector<16x32xf32> -> vector<16x32xf32>
    %60 = arith.addf %33, %59 : vector<16x32xf32>
    %61 = vector.extract_strided_slice %5 {offsets = [0, 8], sizes = [16, 4], strides = [1, 1]} : vector<16x96xf32> to vector<16x4xf32>
    %62 = vector.shape_cast %61 : vector<16x4xf32> to vector<2x8x4xf32>
    %63 = arith.truncf %62 : vector<2x8x4xf32> to vector<2x8x4xbf16>
    %64 = vector.extract_strided_slice %5 {offsets = [0, 40], sizes = [16, 4], strides = [1, 1]} : vector<16x96xf32> to vector<16x4xf32>
    %65 = vector.shape_cast %64 : vector<16x4xf32> to vector<2x8x4xf32>
    %66 = arith.truncf %65 : vector<2x8x4xf32> to vector<2x8x4xbf16>
    %67 = vector.extract_strided_slice %5 {offsets = [0, 72], sizes = [16, 4], strides = [1, 1]} : vector<16x96xf32> to vector<16x4xf32>
    %68 = vector.shape_cast %67 : vector<16x4xf32> to vector<2x8x4xf32>
    %69 = arith.truncf %68 : vector<2x8x4xf32> to vector<2x8x4xbf16>
    "tpu.trace_start"() <{level = 10 : i32, message = "bid,bjd->bij"}> : () -> ()
    %cst_17 = arith.constant dense<0.000000e+00> : vector<2x8x8xf32>
    %70 = tpu.matmul %63, %66, %cst_17 {dimension_numbers = #tpu.dot_dimension_numbers<[2], [2], [1], [1], [0, 0, 0, 1, 1, 1], [0], [0]>} : vector<2x8x4xbf16>, vector<2x8x4xbf16>, vector<2x8x8xf32> -> vector<2x8x8xf32>
    "tpu.trace_stop"() : () -> ()
    %cst_18 = arith.constant dense<0xFF800000> : vector<2x8xf32>
    %71 = vector.multi_reduction <maximumf>, %70, %cst_18 [2] : vector<2x8x8xf32> to vector<2x8xf32>
    %72 = vector.shape_cast %71 : vector<2x8xf32> to vector<2x8x1xf32>
    %73 = vector.broadcast %72 : vector<2x8x1xf32> to vector<2x8x8xf32>
    %74 = arith.subf %70, %73 : vector<2x8x8xf32>
    %75 = math.exp %74 : vector<2x8x8xf32>
    %cst_19 = arith.constant dense<0.000000e+00> : vector<2x8xf32>
    %76 = vector.multi_reduction <add>, %75, %cst_19 [2] : vector<2x8x8xf32> to vector<2x8xf32>
    %77 = vector.shape_cast %76 : vector<2x8xf32> to vector<2x8x1xf32>
    %78 = arith.truncf %75 : vector<2x8x8xf32> to vector<2x8x8xbf16>
    "tpu.trace_start"() <{level = 10 : i32, message = "bij,bjd->bid"}> : () -> ()
    %cst_20 = arith.constant dense<0.000000e+00> : vector<2x8x4xf32>
    %79 = tpu.matmul %78, %69, %cst_20 {dimension_numbers = #tpu.dot_dimension_numbers<[2], [1], [1], [2], [0, 0, 0, 1, 1, 2], [0], [0]>} : vector<2x8x8xbf16>, vector<2x8x4xbf16>, vector<2x8x4xf32> -> vector<2x8x4xf32>
    "tpu.trace_stop"() : () -> ()
    %80 = tpu.reciprocal %77 {approx = true} : vector<2x8x1xf32> -> vector<2x8x1xf32>
    %81 = vector.broadcast %80 : vector<2x8x1xf32> to vector<2x8x4xf32>
    %82 = arith.mulf %79, %81 : vector<2x8x4xf32>
    %83 = vector.shape_cast %82 : vector<2x8x4xf32> to vector<16x4xf32>
    %84 = arith.truncf %83 : vector<16x4xf32> to vector<16x4xbf16>
    %85 = vector.extract_strided_slice %4 {offsets = [8, 0], sizes = [4, 32], strides = [1, 1]} : vector<32x32xbf16> to vector<4x32xbf16>
    %cst_21 = arith.constant dense<0.000000e+00> : vector<16x32xf32>
    %86 = tpu.matmul %84, %85, %cst_21 {dimension_numbers = #tpu.dot_dimension_numbers<[1], [0], [0], [1], [0, 0, 1, 1], [], []>} : vector<16x4xbf16>, vector<4x32xbf16>, vector<16x32xf32> -> vector<16x32xf32>
    %87 = arith.addf %60, %86 : vector<16x32xf32>
    %88 = vector.extract_strided_slice %5 {offsets = [0, 12], sizes = [16, 4], strides = [1, 1]} : vector<16x96xf32> to vector<16x4xf32>
    %89 = vector.shape_cast %88 : vector<16x4xf32> to vector<2x8x4xf32>
    %90 = arith.truncf %89 : vector<2x8x4xf32> to vector<2x8x4xbf16>
    %91 = vector.extract_strided_slice %5 {offsets = [0, 44], sizes = [16, 4], strides = [1, 1]} : vector<16x96xf32> to vector<16x4xf32>
    %92 = vector.shape_cast %91 : vector<16x4xf32> to vector<2x8x4xf32>
    %93 = arith.truncf %92 : vector<2x8x4xf32> to vector<2x8x4xbf16>
    %94 = vector.extract_strided_slice %5 {offsets = [0, 76], sizes = [16, 4], strides = [1, 1]} : vector<16x96xf32> to vector<16x4xf32>
    %95 = vector.shape_cast %94 : vector<16x4xf32> to vector<2x8x4xf32>
    %96 = arith.truncf %95 : vector<2x8x4xf32> to vector<2x8x4xbf16>
    "tpu.trace_start"() <{level = 10 : i32, message = "bid,bjd->bij"}> : () -> ()
    %cst_22 = arith.constant dense<0.000000e+00> : vector<2x8x8xf32>
    %97 = tpu.matmul %90, %93, %cst_22 {dimension_numbers = #tpu.dot_dimension_numbers<[2], [2], [1], [1], [0, 0, 0, 1, 1, 1], [0], [0]>} : vector<2x8x4xbf16>, vector<2x8x4xbf16>, vector<2x8x8xf32> -> vector<2x8x8xf32>
    "tpu.trace_stop"() : () -> ()
    %cst_23 = arith.constant dense<0xFF800000> : vector<2x8xf32>
    %98 = vector.multi_reduction <maximumf>, %97, %cst_23 [2] : vector<2x8x8xf32> to vector<2x8xf32>
    %99 = vector.shape_cast %98 : vector<2x8xf32> to vector<2x8x1xf32>
    %100 = vector.broadcast %99 : vector<2x8x1xf32> to vector<2x8x8xf32>
    %101 = arith.subf %97, %100 : vector<2x8x8xf32>
    %102 = math.exp %101 : vector<2x8x8xf32>
    %cst_24 = arith.constant dense<0.000000e+00> : vector<2x8xf32>
    %103 = vector.multi_reduction <add>, %102, %cst_24 [2] : vector<2x8x8xf32> to vector<2x8xf32>
    %104 = vector.shape_cast %103 : vector<2x8xf32> to vector<2x8x1xf32>
    %105 = arith.truncf %102 : vector<2x8x8xf32> to vector<2x8x8xbf16>
    "tpu.trace_start"() <{level = 10 : i32, message = "bij,bjd->bid"}> : () -> ()
    %cst_25 = arith.constant dense<0.000000e+00> : vector<2x8x4xf32>
    %106 = tpu.matmul %105, %96, %cst_25 {dimension_numbers = #tpu.dot_dimension_numbers<[2], [1], [1], [2], [0, 0, 0, 1, 1, 2], [0], [0]>} : vector<2x8x8xbf16>, vector<2x8x4xbf16>, vector<2x8x4xf32> -> vector<2x8x4xf32>
    "tpu.trace_stop"() : () -> ()
    %107 = tpu.reciprocal %104 {approx = true} : vector<2x8x1xf32> -> vector<2x8x1xf32>
    %108 = vector.broadcast %107 : vector<2x8x1xf32> to vector<2x8x4xf32>
    %109 = arith.mulf %106, %108 : vector<2x8x4xf32>
    %110 = vector.shape_cast %109 : vector<2x8x4xf32> to vector<16x4xf32>
    %111 = arith.truncf %110 : vector<16x4xf32> to vector<16x4xbf16>
    %112 = vector.extract_strided_slice %4 {offsets = [12, 0], sizes = [4, 32], strides = [1, 1]} : vector<32x32xbf16> to vector<4x32xbf16>
    %cst_26 = arith.constant dense<0.000000e+00> : vector<16x32xf32>
    %113 = tpu.matmul %111, %112, %cst_26 {dimension_numbers = #tpu.dot_dimension_numbers<[1], [0], [0], [1], [0, 0, 1, 1], [], []>} : vector<16x4xbf16>, vector<4x32xbf16>, vector<16x32xf32> -> vector<16x32xf32>
    %114 = arith.addf %87, %113 : vector<16x32xf32>
    %115 = vector.extract_strided_slice %5 {offsets = [0, 16], sizes = [16, 4], strides = [1, 1]} : vector<16x96xf32> to vector<16x4xf32>
    %116 = vector.shape_cast %115 : vector<16x4xf32> to vector<2x8x4xf32>
    %117 = arith.truncf %116 : vector<2x8x4xf32> to vector<2x8x4xbf16>
    %118 = vector.extract_strided_slice %5 {offsets = [0, 48], sizes = [16, 4], strides = [1, 1]} : vector<16x96xf32> to vector<16x4xf32>
    %119 = vector.shape_cast %118 : vector<16x4xf32> to vector<2x8x4xf32>
    %120 = arith.truncf %119 : vector<2x8x4xf32> to vector<2x8x4xbf16>
    %121 = vector.extract_strided_slice %5 {offsets = [0, 80], sizes = [16, 4], strides = [1, 1]} : vector<16x96xf32> to vector<16x4xf32>
    %122 = vector.shape_cast %121 : vector<16x4xf32> to vector<2x8x4xf32>
    %123 = arith.truncf %122 : vector<2x8x4xf32> to vector<2x8x4xbf16>
    "tpu.trace_start"() <{level = 10 : i32, message = "bid,bjd->bij"}> : () -> ()
    %cst_27 = arith.constant dense<0.000000e+00> : vector<2x8x8xf32>
    %124 = tpu.matmul %117, %120, %cst_27 {dimension_numbers = #tpu.dot_dimension_numbers<[2], [2], [1], [1], [0, 0, 0, 1, 1, 1], [0], [0]>} : vector<2x8x4xbf16>, vector<2x8x4xbf16>, vector<2x8x8xf32> -> vector<2x8x8xf32>
    "tpu.trace_stop"() : () -> ()
    %cst_28 = arith.constant dense<0xFF800000> : vector<2x8xf32>
    %125 = vector.multi_reduction <maximumf>, %124, %cst_28 [2] : vector<2x8x8xf32> to vector<2x8xf32>
    %126 = vector.shape_cast %125 : vector<2x8xf32> to vector<2x8x1xf32>
    %127 = vector.broadcast %126 : vector<2x8x1xf32> to vector<2x8x8xf32>
    %128 = arith.subf %124, %127 : vector<2x8x8xf32>
    %129 = math.exp %128 : vector<2x8x8xf32>
    %cst_29 = arith.constant dense<0.000000e+00> : vector<2x8xf32>
    %130 = vector.multi_reduction <add>, %129, %cst_29 [2] : vector<2x8x8xf32> to vector<2x8xf32>
    %131 = vector.shape_cast %130 : vector<2x8xf32> to vector<2x8x1xf32>
    %132 = arith.truncf %129 : vector<2x8x8xf32> to vector<2x8x8xbf16>
    "tpu.trace_start"() <{level = 10 : i32, message = "bij,bjd->bid"}> : () -> ()
    %cst_30 = arith.constant dense<0.000000e+00> : vector<2x8x4xf32>
    %133 = tpu.matmul %132, %123, %cst_30 {dimension_numbers = #tpu.dot_dimension_numbers<[2], [1], [1], [2], [0, 0, 0, 1, 1, 2], [0], [0]>} : vector<2x8x8xbf16>, vector<2x8x4xbf16>, vector<2x8x4xf32> -> vector<2x8x4xf32>
    "tpu.trace_stop"() : () -> ()
    %134 = tpu.reciprocal %131 {approx = true} : vector<2x8x1xf32> -> vector<2x8x1xf32>
    %135 = vector.broadcast %134 : vector<2x8x1xf32> to vector<2x8x4xf32>
    %136 = arith.mulf %133, %135 : vector<2x8x4xf32>
    %137 = vector.shape_cast %136 : vector<2x8x4xf32> to vector<16x4xf32>
    %138 = arith.truncf %137 : vector<16x4xf32> to vector<16x4xbf16>
    %139 = vector.extract_strided_slice %4 {offsets = [16, 0], sizes = [4, 32], strides = [1, 1]} : vector<32x32xbf16> to vector<4x32xbf16>
    %cst_31 = arith.constant dense<0.000000e+00> : vector<16x32xf32>
    %140 = tpu.matmul %138, %139, %cst_31 {dimension_numbers = #tpu.dot_dimension_numbers<[1], [0], [0], [1], [0, 0, 1, 1], [], []>} : vector<16x4xbf16>, vector<4x32xbf16>, vector<16x32xf32> -> vector<16x32xf32>
    %141 = arith.addf %114, %140 : vector<16x32xf32>
    %142 = vector.extract_strided_slice %5 {offsets = [0, 20], sizes = [16, 4], strides = [1, 1]} : vector<16x96xf32> to vector<16x4xf32>
    %143 = vector.shape_cast %142 : vector<16x4xf32> to vector<2x8x4xf32>
    %144 = arith.truncf %143 : vector<2x8x4xf32> to vector<2x8x4xbf16>
    %145 = vector.extract_strided_slice %5 {offsets = [0, 52], sizes = [16, 4], strides = [1, 1]} : vector<16x96xf32> to vector<16x4xf32>
    %146 = vector.shape_cast %145 : vector<16x4xf32> to vector<2x8x4xf32>
    %147 = arith.truncf %146 : vector<2x8x4xf32> to vector<2x8x4xbf16>
    %148 = vector.extract_strided_slice %5 {offsets = [0, 84], sizes = [16, 4], strides = [1, 1]} : vector<16x96xf32> to vector<16x4xf32>
    %149 = vector.shape_cast %148 : vector<16x4xf32> to vector<2x8x4xf32>
    %150 = arith.truncf %149 : vector<2x8x4xf32> to vector<2x8x4xbf16>
    "tpu.trace_start"() <{level = 10 : i32, message = "bid,bjd->bij"}> : () -> ()
    %cst_32 = arith.constant dense<0.000000e+00> : vector<2x8x8xf32>
    %151 = tpu.matmul %144, %147, %cst_32 {dimension_numbers = #tpu.dot_dimension_numbers<[2], [2], [1], [1], [0, 0, 0, 1, 1, 1], [0], [0]>} : vector<2x8x4xbf16>, vector<2x8x4xbf16>, vector<2x8x8xf32> -> vector<2x8x8xf32>
    "tpu.trace_stop"() : () -> ()
    %cst_33 = arith.constant dense<0xFF800000> : vector<2x8xf32>
    %152 = vector.multi_reduction <maximumf>, %151, %cst_33 [2] : vector<2x8x8xf32> to vector<2x8xf32>
    %153 = vector.shape_cast %152 : vector<2x8xf32> to vector<2x8x1xf32>
    %154 = vector.broadcast %153 : vector<2x8x1xf32> to vector<2x8x8xf32>
    %155 = arith.subf %151, %154 : vector<2x8x8xf32>
    %156 = math.exp %155 : vector<2x8x8xf32>
    %cst_34 = arith.constant dense<0.000000e+00> : vector<2x8xf32>
    %157 = vector.multi_reduction <add>, %156, %cst_34 [2] : vector<2x8x8xf32> to vector<2x8xf32>
    %158 = vector.shape_cast %157 : vector<2x8xf32> to vector<2x8x1xf32>
    %159 = arith.truncf %156 : vector<2x8x8xf32> to vector<2x8x8xbf16>
    "tpu.trace_start"() <{level = 10 : i32, message = "bij,bjd->bid"}> : () -> ()
    %cst_35 = arith.constant dense<0.000000e+00> : vector<2x8x4xf32>
    %160 = tpu.matmul %159, %150, %cst_35 {dimension_numbers = #tpu.dot_dimension_numbers<[2], [1], [1], [2], [0, 0, 0, 1, 1, 2], [0], [0]>} : vector<2x8x8xbf16>, vector<2x8x4xbf16>, vector<2x8x4xf32> -> vector<2x8x4xf32>
    "tpu.trace_stop"() : () -> ()
    %161 = tpu.reciprocal %158 {approx = true} : vector<2x8x1xf32> -> vector<2x8x1xf32>
    %162 = vector.broadcast %161 : vector<2x8x1xf32> to vector<2x8x4xf32>
    %163 = arith.mulf %160, %162 : vector<2x8x4xf32>
    %164 = vector.shape_cast %163 : vector<2x8x4xf32> to vector<16x4xf32>
    %165 = arith.truncf %164 : vector<16x4xf32> to vector<16x4xbf16>
    %166 = vector.extract_strided_slice %4 {offsets = [20, 0], sizes = [4, 32], strides = [1, 1]} : vector<32x32xbf16> to vector<4x32xbf16>
    %cst_36 = arith.constant dense<0.000000e+00> : vector<16x32xf32>
    %167 = tpu.matmul %165, %166, %cst_36 {dimension_numbers = #tpu.dot_dimension_numbers<[1], [0], [0], [1], [0, 0, 1, 1], [], []>} : vector<16x4xbf16>, vector<4x32xbf16>, vector<16x32xf32> -> vector<16x32xf32>
    %168 = arith.addf %141, %167 : vector<16x32xf32>
    %169 = vector.extract_strided_slice %5 {offsets = [0, 24], sizes = [16, 4], strides = [1, 1]} : vector<16x96xf32> to vector<16x4xf32>
    %170 = vector.shape_cast %169 : vector<16x4xf32> to vector<2x8x4xf32>
    %171 = arith.truncf %170 : vector<2x8x4xf32> to vector<2x8x4xbf16>
    %172 = vector.extract_strided_slice %5 {offsets = [0, 56], sizes = [16, 4], strides = [1, 1]} : vector<16x96xf32> to vector<16x4xf32>
    %173 = vector.shape_cast %172 : vector<16x4xf32> to vector<2x8x4xf32>
    %174 = arith.truncf %173 : vector<2x8x4xf32> to vector<2x8x4xbf16>
    %175 = vector.extract_strided_slice %5 {offsets = [0, 88], sizes = [16, 4], strides = [1, 1]} : vector<16x96xf32> to vector<16x4xf32>
    %176 = vector.shape_cast %175 : vector<16x4xf32> to vector<2x8x4xf32>
    %177 = arith.truncf %176 : vector<2x8x4xf32> to vector<2x8x4xbf16>
    "tpu.trace_start"() <{level = 10 : i32, message = "bid,bjd->bij"}> : () -> ()
    %cst_37 = arith.constant dense<0.000000e+00> : vector<2x8x8xf32>
    %178 = tpu.matmul %171, %174, %cst_37 {dimension_numbers = #tpu.dot_dimension_numbers<[2], [2], [1], [1], [0, 0, 0, 1, 1, 1], [0], [0]>} : vector<2x8x4xbf16>, vector<2x8x4xbf16>, vector<2x8x8xf32> -> vector<2x8x8xf32>
    "tpu.trace_stop"() : () -> ()
    %cst_38 = arith.constant dense<0xFF800000> : vector<2x8xf32>
    %179 = vector.multi_reduction <maximumf>, %178, %cst_38 [2] : vector<2x8x8xf32> to vector<2x8xf32>
    %180 = vector.shape_cast %179 : vector<2x8xf32> to vector<2x8x1xf32>
    %181 = vector.broadcast %180 : vector<2x8x1xf32> to vector<2x8x8xf32>
    %182 = arith.subf %178, %181 : vector<2x8x8xf32>
    %183 = math.exp %182 : vector<2x8x8xf32>
    %cst_39 = arith.constant dense<0.000000e+00> : vector<2x8xf32>
    %184 = vector.multi_reduction <add>, %183, %cst_39 [2] : vector<2x8x8xf32> to vector<2x8xf32>
    %185 = vector.shape_cast %184 : vector<2x8xf32> to vector<2x8x1xf32>
    %186 = arith.truncf %183 : vector<2x8x8xf32> to vector<2x8x8xbf16>
    "tpu.trace_start"() <{level = 10 : i32, message = "bij,bjd->bid"}> : () -> ()
    %cst_40 = arith.constant dense<0.000000e+00> : vector<2x8x4xf32>
    %187 = tpu.matmul %186, %177, %cst_40 {dimension_numbers = #tpu.dot_dimension_numbers<[2], [1], [1], [2], [0, 0, 0, 1, 1, 2], [0], [0]>} : vector<2x8x8xbf16>, vector<2x8x4xbf16>, vector<2x8x4xf32> -> vector<2x8x4xf32>
    "tpu.trace_stop"() : () -> ()
    %188 = tpu.reciprocal %185 {approx = true} : vector<2x8x1xf32> -> vector<2x8x1xf32>
    %189 = vector.broadcast %188 : vector<2x8x1xf32> to vector<2x8x4xf32>
    %190 = arith.mulf %187, %189 : vector<2x8x4xf32>
    %191 = vector.shape_cast %190 : vector<2x8x4xf32> to vector<16x4xf32>
    %192 = arith.truncf %191 : vector<16x4xf32> to vector<16x4xbf16>
    %193 = vector.extract_strided_slice %4 {offsets = [24, 0], sizes = [4, 32], strides = [1, 1]} : vector<32x32xbf16> to vector<4x32xbf16>
    %cst_41 = arith.constant dense<0.000000e+00> : vector<16x32xf32>
    %194 = tpu.matmul %192, %193, %cst_41 {dimension_numbers = #tpu.dot_dimension_numbers<[1], [0], [0], [1], [0, 0, 1, 1], [], []>} : vector<16x4xbf16>, vector<4x32xbf16>, vector<16x32xf32> -> vector<16x32xf32>
    %195 = arith.addf %168, %194 : vector<16x32xf32>
    %196 = vector.extract_strided_slice %5 {offsets = [0, 28], sizes = [16, 4], strides = [1, 1]} : vector<16x96xf32> to vector<16x4xf32>
    %197 = vector.shape_cast %196 : vector<16x4xf32> to vector<2x8x4xf32>
    %198 = arith.truncf %197 : vector<2x8x4xf32> to vector<2x8x4xbf16>
    %199 = vector.extract_strided_slice %5 {offsets = [0, 60], sizes = [16, 4], strides = [1, 1]} : vector<16x96xf32> to vector<16x4xf32>
    %200 = vector.shape_cast %199 : vector<16x4xf32> to vector<2x8x4xf32>
    %201 = arith.truncf %200 : vector<2x8x4xf32> to vector<2x8x4xbf16>
    %202 = vector.extract_strided_slice %5 {offsets = [0, 92], sizes = [16, 4], strides = [1, 1]} : vector<16x96xf32> to vector<16x4xf32>
    %203 = vector.shape_cast %202 : vector<16x4xf32> to vector<2x8x4xf32>
    %204 = arith.truncf %203 : vector<2x8x4xf32> to vector<2x8x4xbf16>
    "tpu.trace_start"() <{level = 10 : i32, message = "bid,bjd->bij"}> : () -> ()
    %cst_42 = arith.constant dense<0.000000e+00> : vector<2x8x8xf32>
    %205 = tpu.matmul %198, %201, %cst_42 {dimension_numbers = #tpu.dot_dimension_numbers<[2], [2], [1], [1], [0, 0, 0, 1, 1, 1], [0], [0]>} : vector<2x8x4xbf16>, vector<2x8x4xbf16>, vector<2x8x8xf32> -> vector<2x8x8xf32>
    "tpu.trace_stop"() : () -> ()
    %cst_43 = arith.constant dense<0xFF800000> : vector<2x8xf32>
    %206 = vector.multi_reduction <maximumf>, %205, %cst_43 [2] : vector<2x8x8xf32> to vector<2x8xf32>
    %207 = vector.shape_cast %206 : vector<2x8xf32> to vector<2x8x1xf32>
    %208 = vector.broadcast %207 : vector<2x8x1xf32> to vector<2x8x8xf32>
    %209 = arith.subf %205, %208 : vector<2x8x8xf32>
    %210 = math.exp %209 : vector<2x8x8xf32>
    %cst_44 = arith.constant dense<0.000000e+00> : vector<2x8xf32>
    %211 = vector.multi_reduction <add>, %210, %cst_44 [2] : vector<2x8x8xf32> to vector<2x8xf32>
    %212 = vector.shape_cast %211 : vector<2x8xf32> to vector<2x8x1xf32>
    %213 = arith.truncf %210 : vector<2x8x8xf32> to vector<2x8x8xbf16>
    "tpu.trace_start"() <{level = 10 : i32, message = "bij,bjd->bid"}> : () -> ()
    %cst_45 = arith.constant dense<0.000000e+00> : vector<2x8x4xf32>
    %214 = tpu.matmul %213, %204, %cst_45 {dimension_numbers = #tpu.dot_dimension_numbers<[2], [1], [1], [2], [0, 0, 0, 1, 1, 2], [0], [0]>} : vector<2x8x8xbf16>, vector<2x8x4xbf16>, vector<2x8x4xf32> -> vector<2x8x4xf32>
    "tpu.trace_stop"() : () -> ()
    %215 = tpu.reciprocal %212 {approx = true} : vector<2x8x1xf32> -> vector<2x8x1xf32>
    %216 = vector.broadcast %215 : vector<2x8x1xf32> to vector<2x8x4xf32>
    %217 = arith.mulf %214, %216 : vector<2x8x4xf32>
    %218 = vector.shape_cast %217 : vector<2x8x4xf32> to vector<16x4xf32>
    %219 = arith.truncf %218 : vector<16x4xf32> to vector<16x4xbf16>
    %220 = vector.extract_strided_slice %4 {offsets = [28, 0], sizes = [4, 32], strides = [1, 1]} : vector<32x32xbf16> to vector<4x32xbf16>
    %cst_46 = arith.constant dense<0.000000e+00> : vector<16x32xf32>
    %221 = tpu.matmul %219, %220, %cst_46 {dimension_numbers = #tpu.dot_dimension_numbers<[1], [0], [0], [1], [0, 0, 1, 1], [], []>} : vector<16x4xbf16>, vector<4x32xbf16>, vector<16x32xf32> -> vector<16x32xf32>
    %222 = arith.addf %195, %221 : vector<16x32xf32>
    %223 = vector.shape_cast %222 : vector<16x32xf32> to vector<2x8x32xf32>
    %c0_47 = arith.constant 0 : index
    %c0_48 = arith.constant 0 : index
    %c0_49 = arith.constant 0 : index
    %224 = vector.load %arg4[%c0_47, %c0_48, %c0_49] : memref<2x8x32xf32, #tpu.memory_space<vmem>>, vector<2x8x32xf32>
    tpu.vector_store %arg4[%c0_47, %c0_48, %c0_49], %223 {strides = array<i32>} : memref<2x8x32xf32, #tpu.memory_space<vmem>>, vector<2x8x32xf32>,
    return
  }
  func.func @transform_0(%arg0: i32) -> (i32, i32, i32) {
    %c0_i32 = arith.constant 0 : i32
    %c0_i32_0 = arith.constant 0 : i32
    %c0_i32_1 = arith.constant 0 : i32
    return %arg0, %c0_i32, %c0_i32_0 : i32, i32, i32
  }
  func.func @transform_1(%arg0: i32) -> (i32, i32) {
    %c0_i32 = arith.constant 0 : i32
    %c0_i32_0 = arith.constant 0 : i32
    %c0_i32_1 = arith.constant 0 : i32
    return %c0_i32, %c0_i32_0 : i32, i32
  }
  func.func @transform_2(%arg0: i32) -> (i32, i32) {
    %c0_i32 = arith.constant 0 : i32
    %c0_i32_0 = arith.constant 0 : i32
    %c0_i32_1 = arith.constant 0 : i32
    return %c0_i32, %c0_i32_0 : i32, i32
  }
  func.func @transform_3(%arg0: i32) -> (i32, i32, i32) {
    %c0_i32 = arith.constant 0 : i32
    %c0_i32_0 = arith.constant 0 : i32
    %c0_i32_1 = arith.constant 0 : i32
    return %arg0, %c0_i32, %c0_i32_0 : i32, i32, i32
  }
}

</mosaic_0001>

<bundles_post_ra>
// kernel: tpu_custom_call.1
= control target key start
LH: loop header
LB: loop body
LE: loop exit
PB: predicated region body
PF: predicated region fallthrough
CT: control target
= control target key end

     0   :  { %8 = vsyncpa [#allocation3], 0  ;;  %s3387_s0 = inlined_call_operand.hbm [shape: f32[2,8,32], index: 0, kind: input, shape index: {}]   ;;  %s3388_s1 = inlined_call_operand.hbm [shape: bf16[32,96], index: 1, kind: input, shape index: {}]   ;;  %s3389_s2 = inlined_call_operand.hbm [shape: bf16[32,32], index: 2, kind: input, shape index: {}]   ;;  %s3390_s3 = inlined_call_operand.hbm [shape: f32[2,8,32], index: 3, kind: output, shape index: {}]  }
   0x1   :  { %9 = vsyncpa [#allocation6], 0 }
   0x2   :  { %10 = vsyncpa [#allocation4], 0  ;;  %s2923_s12 = smov [#allocation5]   ;;  %s2829_s16 = scalar_lea.hbm %s3388_s1, 256 }
   0x3   :  { %s28_s13 = sshll.u32 %s2923_s12, 4  ;;  %p2830_p0 = scmp.ne.s32.totalorder %s3388_s1, %s2829_s16  ;;  %s29_s13 = int_to_ptr.vmem [resolvable:$true] %s28_s13 }
   0x4   :  { %p2833_p1 = scmp.lt.u32.totalorder %s2829_s16, %s3388_s1 }
   0x6   :  { %p2835_p2 = pnand %p2833_p1, %p2830_p0 }
   0x8   :  { %2838 = shalt.err (!%p2835_p2)
}
   0x9   :  { %s2839_s21 = scalar_lea.vmem %s29_s13, 256  ;;  %p2844_p4 = scmp.lt.s32.totalorder %s29_s13, %s29_s13 }
   0xa   :  { %p2840_p3 = scmp.ne.s32.totalorder %s29_s13, %s2839_s21  ;;  %p2845_p5 = scmp.lt.s32.totalorder %s2839_s21, %s2839_s21 }
   0xc   :  { %p2846_p6 = por %p2845_p5, %p2844_p4 }
   0xe   :  { %p2847_p7 = pnand %p2846_p6, %p2840_p3 }
  0x10   :  { %2850 = shalt.err (!%p2847_p7)
}
  0x11   :  { %s2924_s22 = smov 64   ;;  %s2925_s23 = smov 4  }
  0x12   :  { %34 = dma.hbm_to_vmem [thread:$0]  %s3388_s1, 256, %s29_s13, [#allocation6], %s2924_s22, %s2924_s22, %s2925_s23  }
  0x13   :  { %s2926_s26 = smov [#allocation2]   ;;  %s2851_s30 = scalar_lea.hbm %s3387_s0, 256 }
  0x14   :  { %s16_s27 = sshll.u32 %s2926_s26, 4  ;;  %p2852_p8 = scmp.ne.s32.totalorder %s3387_s0, %s2851_s30  ;;  %s17_s27 = int_to_ptr.vmem [resolvable:$true] %s16_s27 }
  0x15   :  { %p2855_p9 = scmp.lt.u32.totalorder %s2851_s30, %s3387_s0 }
  0x17   :  { %p2857_p10 = pnand %p2855_p9, %p2852_p8 }
  0x19   :  { %2860 = shalt.err (!%p2857_p10)
}
  0x1a   :  { %s2861_s8 = scalar_lea.vmem %s17_s27, 256  ;;  %p2866_p12 = scmp.lt.s32.totalorder %s17_s27, %s17_s27 }
  0x1b   :  { %p2862_p11 = scmp.ne.s32.totalorder %s17_s27, %s2861_s8  ;;  %p2867_p13 = scmp.lt.s32.totalorder %s2861_s8, %s2861_s8 }
  0x1d   :  { %p2868_p0 = por %p2867_p13, %p2866_p12 }
  0x1f   :  { %p2869_p1 = pnand %p2868_p0, %p2862_p11 }
  0x21   :  { %2872 = shalt.err (!%p2869_p1)
}
  0x22   :  { %s2927_s1 = smov 128   ;;  %s2928_s9 = smov 8  }
  0x23   :  { %22 = dma.hbm_to_vmem [thread:$0]  %s3387_s0, 256, %s17_s27, [#allocation3], %s2927_s1, %s2927_s1, %s2928_s9  }
  0x24   :  { %s2929_s12 = smov [#allocation7]   ;;  %s2873_s16 = scalar_lea.hbm %s3389_s2, 256 }
  0x25   :  { %s40_s13 = sshll.u32 %s2929_s12, 4  ;;  %p2874_p2 = scmp.ne.s32.totalorder %s3389_s2, %s2873_s16  ;;  %s41_s13 = int_to_ptr.vmem [resolvable:$true] %s40_s13 }
  0x26   :  { %p2877_p3 = scmp.lt.u32.totalorder %s2873_s16, %s3389_s2 }
  0x28   :  { %p2879_p4 = pnand %p2877_p3, %p2874_p2 }
  0x2a   :  { %2882 = shalt.err (!%p2879_p4)
}
  0x2b   :  { %s2883_s21 = scalar_lea.vmem %s41_s13, 256  ;;  %p2888_p6 = scmp.lt.s32.totalorder %s41_s13, %s41_s13 }
  0x2c   :  { %p2884_p5 = scmp.ne.s32.totalorder %s41_s13, %s2883_s21  ;;  %p2889_p7 = scmp.lt.s32.totalorder %s2883_s21, %s2883_s21 }
  0x2e   :  { %p2890_p8 = por %p2889_p7, %p2888_p6 }
  0x30   :  { %p2891_p9 = pnand %p2890_p8, %p2884_p5 }
  0x32   :  { %2894 = shalt.err (!%p2891_p9)
}
  0x33   :  { %46 = dma.hbm_to_vmem [thread:$0]  %s3389_s2, 256, %s41_s13, [#allocation6], %s2924_s22, %s2924_s22, %s2925_s23  }
  0x34   :  { %2917 = dma.done.wait [#allocation3], 256  }
  0x35   :  { %2918 = vsyncadd [#allocation3], 4294967040 }
  0x36   :  { %2919 = dma.done.wait [#allocation6], 512  }
  0x37   :  { %2920 = vsyncadd [#allocation6], 4294966784  ;;  %v2930_v0 = vmov 0.0   ;;  %vm2931_vm0 = vmmov 0   ;;  %v2759_v1 = vld [vmem:[#allocation5] sm:$0xff]   ;;  %v2760_v2 = vld [vmem:[#allocation5 + $0x8] sm:$0xff]  }
  0x38   :  { %2451 = vmatprep.subr.bf16.mxu0 %v2930_v0  ;;  %2455 = vmatprep.mubr.msk.bf16.mxu0 %vm2931_vm0, %v2930_v0  ;;  %v57_v3 = vld [vmem:[#allocation2] sm:$0xff]  ;;  %v58_v4 = vld [vmem:[#allocation2 + $0x8] sm:$0xff]  ;;  %vm80_vm1 = vcmask 261120   ;;  %s2932_s2 = smov 96   ;;  %s2933_s23 = smov 92   ;;  %vm130_vm2 = vcmask 31744  }
  0x39   :  { %2459 = vmatprep.subr.bf16.mxu1 %v2930_v0  ;;  %2461 = vmatprep.mubr.msk.bf16.mxu1 %vm2931_vm0, %v2930_v0  ;;  %v59_v5 = vpack.c.bf16 %v58_v4, %v57_v3  ;;  %s2934_s25 = smov 124   ;;  %vm226_vm3 = vcmask 64512   ;;  %s2935_s26 = smov 60   ;;  %vm252_vm4 = vcmask 1043456   ;;  %vm577_vm5 = vcmask 1041408  }
  0x3a   :  { %2452 = vmatpush3.bf16.msra.mxu0 %v2759_v1  ;;  %s2936_s27 = smov 88   ;;  %s2937_s28 = smov 120  }
  0x3b   :  { %2453 = vmatprep.subr.bf16.mxu0 %v2930_v0  ;;  %s2939_s29 = smov 116   ;;  %s2940_s30 = smov 84  }
  0x3c   :  { %s2941_s4 = smov 52   ;;  %s2942_s5 = smov 80  }
  0x3d   :  { %s2943_s6 = smov 112   ;;  %s2944_s7 = smov 76  }
  0x3e   :  { %2454 = vmatpush3.bf16.msra.mxu0 %v2760_v2  ;;  %s2945_s8 = smov 48   ;;  %s2946_s10 = smov 108  }
  0x3f   :  { %2465 = vmatprep.subr.bf16.mxu0 %v2930_v0  ;;  %s2947_s11 = smov 44   ;;  %s2948_s12 = smov 72  }
  0x40   :  { %s2949_s13 = smov 104   ;;  %s2950_s14 = smov 40  }
  0x41   :  { %2456 = vmatmul.mubr.msk.bf16.vlgmr.msra.gmra.mrb[0].mxu0 %vm80_vm1, %v59_v5  ;;  %s2951_s15 = smov 68   ;;  %s2952_s16 = smov 100  }
  0x42   :  { %2467 = vmatprep.mubr.msk.bf16.mxu0 %vm2931_vm0, %v2930_v0  ;;  %s2953_s17 = smov 36   ;;  %s2954_s18 = smov [#allocation8]  }
  0x43   :  { %s2308_s19 = sshll.u32 %s2954_s18, 4  ;;  %s2309_s19 = int_to_ptr.vmem [resolvable:$true] %s2308_s19 }
  0x44   :  { %s2895_s20 = scalar_lea.vmem %s2309_s19, 256  ;;  %p2900_p11 = scmp.lt.s32.totalorder %s2309_s19, %s2309_s19 }
  0x45   :  { %p2896_p10 = scmp.ne.s32.totalorder %s2309_s19, %s2895_s20  ;;  %p2901_p12 = scmp.lt.s32.totalorder %s2895_s20, %s2895_s20 }
  0x47   :  { %p2902_p13 = por %p2901_p12, %p2900_p11 }
  0x49   :  { %p2903_p0 = pnand %p2902_p13, %p2896_p10 }
 0x114   :  { %v118_v6 = vpop.f32.mrb[0].mxu0 }
 0x115   :  { %v2457_v7 = vpop.f32.mrb[1].mxu0  ;;  %v3034_v11 = vpack.c.bf16 %v118_v6, %v118_v6 }
 0x116   :  { %v121_v8 = vpop.f32.mrb[2].mxu0 }
 0x117   :  { %v3031_v9 = vpack.c.bf16 %v121_v8, %v121_v8  ;;  %v2458_v10 = vpop.f32.mrb[3].mxu0 }
 0x119   :  { %178 = vrot.lane.b32.xlu0 %v3031_v9, %s2932_s2 }
 0x11d   :  { %128 = vrot.lane.b32.xlu0 %v3034_v11, %s2932_s2 }
 0x121   :  { %401 = vrot.lane.b32.xlu0 %v3031_v9, %s2933_s23 }
 0x125   :  { %399 = vrot.lane.b32.xlu0 %v3031_v9, %s2934_s25 }
 0x18b   :  { %v179_v12 = vpop.permute.xlu0 %178 }
 0x18c   :  { %v184_v13 = vsel %vm130_vm2, %v179_v12, 0 }
 0x18d   :  { %2466 = vmatpush3.bf16.xpose.msra.mxu0 %v184_v13 }
 0x18e   :  { %2477 = vmatprep.subr.bf16.mxu0 %v2930_v0 }
 0x18f   :  { %v129_v14 = vpop.permute.xlu0 %128 }
 0x190   :  { %v135_v15 = vsel %vm130_vm2, %v129_v14, 0 }
 0x191   :  { %2460 = vmatpush3.bf16.xpose.msra.mxu1 %v135_v15 }
 0x192   :  { %2471 = vmatprep.subr.bf16.mxu1 %v2930_v0 }
 0x193   :  { %v402_v26 = vpop.permute.xlu0 %401 }
 0x194   :  { %2468 = vmatmul.mubr.msk.bf16.vlgmr.msra.gmra.mrb[4].mxu0 %vm130_vm2, %v3031_v9  ;;  %v407_v40 = vsel %vm130_vm2, %v402_v26, 0 }
 0x195   :  { %2479 = vmatprep.mubr.msk.bf16.mxu0 %vm2931_vm0, %v2930_v0 }
 0x197   :  { %v400_v27 = vpop.permute.xlu0 %399 }
 0x198   :  { %2462 = vmatmul.mubr.msk.bf16.vlgmr.msra.gmra.mrb[0].mxu1 %vm130_vm2, %v3034_v11 }
 0x199   :  { %2473 = vmatprep.mubr.msk.bf16.mxu1 %vm2931_vm0, %v2930_v0 }
 0x267   :  { %v220_v16 = vpop.f32.mrb[4].mxu0 }
 0x268   :  { %v2469_v17 = vpop.f32.mrb[5].mxu0  ;;  %v230_v18 = vsel %vm226_vm3, %v220_v16, -inf }
 0x269   :  { %231 = vmax.xlane.f32.xlu1 %v230_v18  ;;  %v223_v19 = vpop.f32.mrb[6].mxu0 }
 0x26a   :  { %v2470_v20 = vpop.f32.mrb[7].mxu0 }
 0x26b   :  { %v171_v21 = vpop.f32.mrb[0].mxu1 }
 0x26c   :  { %v2463_v22 = vpop.f32.mrb[1].mxu1  ;;  %v227_v23 = vsel %vm226_vm3, %v171_v21, -inf }
 0x26d   :  { %228 = vmax.xlane.f32.xlu0 %v227_v23  ;;  %v174_v24 = vpop.f32.mrb[2].mxu1 }
 0x26e   :  { %v2464_v25 = vpop.f32.mrb[3].mxu1 }
 0x27a   :  { %296 = vrot.lane.b32.xlu1 %v3031_v9, %s2924_s22 }
 0x27e   :  { %247 = vrot.lane.b32.xlu1 %v3034_v11, %s2924_s22  ;;  %s2938_s22 = smov 56  }
 0x282   :  { %351 = vrot.lane.b32.xlu1 %v3034_v11, %s2933_s23 }
 0x283   :  { %517 = vrot.lane.b32.xlu0 %v3031_v9, %s2935_s26 }
 0x286   :  { %349 = vrot.lane.b32.xlu1 %v3034_v11, %s2934_s25 }
 0x287   :  { %671 = vrot.lane.b32.xlu0 %v3034_v11, %s2936_s27 }
 0x28b   :  { %721 = vrot.lane.b32.xlu0 %v3031_v9, %s2936_s27 }
 0x28f   :  { %719 = vrot.lane.b32.xlu0 %v3031_v9, %s2937_s28 }
 0x2f6   :  { %v232_v28 = vpop.xlane.xlu1 %231 }
 0x2f7   :  { %v234_v29 = vsub.f32 %v220_v16, %v232_v28 }
 0x2f9   :  { %v237_v30 = vmul.f32 1.442695, %v234_v29 }
 0x2fa   :  { %v229_v31 = vpop.xlane.xlu0 %228  ;;  %v297_v32 = vpop.permute.xlu1 %296 }
 0x2fb   :  { %2765 = vpow2.f32 %v237_v30  ;;  %v233_v33 = vsub.f32 %v171_v21, %v229_v31  ;;  %v302_v34 = vsel %vm252_vm4, %v297_v32, 0 }
 0x2fc   :  { %2478 = vmatpush3.bf16.msra.mxu0 %v302_v34 }
 0x2fd   :  { %v235_v35 = vmul.f32 1.442695, %v233_v33  ;;  %2489 = vmatprep.subr.bf16.mxu0 %v2930_v0 }
 0x2fe   :  { %v248_v36 = vpop.permute.xlu1 %247  ;;  %v518_v45 = vpop.permute.xlu0 %517 }
 0x2ff   :  { %2767 = vpow2.f32 %v235_v35  ;;  %v254_v37 = vsel %vm252_vm4, %v248_v36, 0  ;;  %v523_v46 = vsel %vm252_vm4, %v518_v45, 0 }
 0x300   :  { %2472 = vmatpush3.bf16.msra.mxu1 %v254_v37 }
 0x301   :  { %2483 = vmatprep.subr.bf16.mxu1 %v2930_v0 }
 0x302   :  { %v352_v42 = vpop.permute.xlu1 %351  ;;  %v672_v3 = vpop.permute.xlu0 %671 }
 0x303   :  { %v357_v44 = vsel %vm130_vm2, %v352_v42, 0  ;;  %v677_v20 = vsel %vm130_vm2, %v672_v3, 0 }
 0x305   :  { %v3073_v38 = vpop.eup %2765 }
 0x306   :  { %v246_v39 = vpack.c.bf16 %v3073_v38, %v3073_v38  ;;  %v350_v47 = vpop.permute.xlu1 %349  ;;  %v722_v4 = vpop.permute.xlu0 %721  ;;  %v242_v25 = vsel %vm226_vm3, %v3073_v38, 0.0 }
 0x307   :  { %v727_v26 = vsel %vm130_vm2, %v722_v4, 0 }
 0x308   :  { %2480 = vmatmul.mubr.msk.bf16.vlgmr.msra.gmra.mrb[8].mxu0 %vm226_vm3, %v246_v39 }
 0x309   :  { %v3079_v41 = vpop.eup %2767  ;;  %2490 = vmatpush3.bf16.xpose.msra.mxu0 %v407_v40  ;;  %2491 = vmatprep.mubr.msk.bf16.mxu0 %vm2931_vm0, %v2930_v0 }
 0x30a   :  { %v245_v43 = vpack.c.bf16 %v3079_v41, %v3079_v41  ;;  %2501 = vmatprep.subr.bf16.mxu0 %v2930_v0  ;;  %v720_v5 = vpop.permute.xlu0 %719  ;;  %v239_v23 = vsel %vm226_vm3, %v3079_v41, 0.0 }
 0x30c   :  { %2474 = vmatmul.mubr.msk.bf16.vlgmr.msra.gmra.mrb[4].mxu1 %vm226_vm3, %v245_v43 }
 0x30d   :  { %2484 = vmatpush3.bf16.xpose.msra.mxu1 %v357_v44  ;;  %2485 = vmatprep.mubr.msk.bf16.mxu1 %vm2931_vm0, %v2930_v0 }
 0x30e   :  { %2495 = vmatprep.subr.bf16.mxu1 %v2930_v0 }
 0x310   :  { %2492 = vmatmul.mubr.msk.bf16.vlgmr.msra.gmra.mrb[12].mxu0 %vm130_vm2, %v400_v27  ;;  %v64_v27 = vld [vmem:[#allocation7] sm:$0xf] }
 0x311   :  { %2502 = vmatpush3.bf16.msra.mxu0 %v523_v46  ;;  %2503 = vmatprep.mubr.msk.bf16.mxu0 %vm2931_vm0, %v2930_v0  ;;  %v2332_v28 = vcombine.low %v64_v27, %v64_v27 }
 0x312   :  { %2519 = vmatprep.subr.bf16.mxu0 %v2930_v0 }
 0x313   :  { %v573_v29 = vrot.slane %v2332_v28, 2 }
 0x314   :  { %2486 = vmatmul.mubr.msk.bf16.vlgmr.msra.gmra.mrb[8].mxu1 %vm130_vm2, %v350_v47 }
 0x315   :  { %2497 = vmatprep.mubr.msk.bf16.mxu1 %vm2931_vm0, %v2930_v0  ;;  %v579_v30 = vsel %vm577_vm5, %v573_v29, 0 }
 0x3db   :  { %v3099_v48 = vpop.f32.mrb[8].mxu0 }
 0x3dc   :  { %v2481_v49 = vpop.f32.mrb[9].mxu0 }
 0x3dd   :  { %v341_v50 = vpop.f32.mrb[10].mxu0 }
 0x3de   :  { %v2482_v51 = vpop.f32.mrb[11].mxu0 }
 0x3df   :  { %v3101_v52 = vpop.f32.mrb[4].mxu1 }
 0x3e0   :  { %v2475_v53 = vpop.f32.mrb[5].mxu1 }
 0x3e1   :  { %v293_v54 = vpop.f32.mrb[6].mxu1 }
 0x3e2   :  { %v2476_v55 = vpop.f32.mrb[7].mxu1 }
 0x3e3   :  { %v443_v56 = vpop.f32.mrb[12].mxu0 }
 0x3e4   :  { %v2493_v57 = vpop.f32.mrb[13].mxu0  ;;  %v452_v58 = vsel %vm226_vm3, %v443_v56, -inf }
 0x3e5   :  { %453 = vmax.xlane.f32.xlu1 %v452_v58  ;;  %v446_v59 = vpop.f32.mrb[14].mxu0 }
 0x3e6   :  { %v2494_v60 = vpop.f32.mrb[15].mxu0 }
 0x3e7   :  { %v393_v61 = vpop.f32.mrb[8].mxu1 }
 0x3e8   :  { %v2487_v62 = vpop.f32.mrb[9].mxu1  ;;  %v449_v63 = vsel %vm226_vm3, %v393_v61, -inf }
 0x3e9   :  { %450 = vmax.xlane.f32.xlu0 %v449_v63  ;;  %v396_v1 = vpop.f32.mrb[10].mxu1 }
 0x3ea   :  { %v2488_v2 = vpop.f32.mrb[11].mxu1 }
 0x3f6   :  { %669 = vrot.lane.b32.xlu1 %v3034_v11, %s2937_s28 }
 0x3fa   :  { %469 = vrot.lane.b32.xlu1 %v3034_v11, %s2935_s26 }
 0x472   :  { %v454_v6 = vpop.xlane.xlu1 %453 }
 0x473   :  { %v456_v7 = vsub.f32 %v443_v56, %v454_v6 }
 0x475   :  { %v459_v8 = vmul.f32 1.442695, %v456_v7 }
 0x476   :  { %v451_v10 = vpop.xlane.xlu0 %450  ;;  %v670_v12 = vpop.permute.xlu1 %669 }
 0x477   :  { %2769 = vpow2.f32 %v459_v8  ;;  %v455_v13 = vsub.f32 %v393_v61, %v451_v10 }
 0x479   :  { %v457_v14 = vmul.f32 1.442695, %v455_v13 }
 0x47a   :  { %v470_v15 = vpop.permute.xlu1 %469 }
 0x47b   :  { %2771 = vpow2.f32 %v457_v14  ;;  %v475_v16 = vsel %vm252_vm4, %v470_v15, 0 }
 0x47c   :  { %2496 = vmatpush3.bf16.msra.mxu1 %v475_v16 }
 0x47d   :  { %2507 = vmatprep.subr.bf16.mxu1 %v2930_v0 }
 0x481   :  { %v2770_v17 = vpop.eup %2769 }
 0x482   :  { %v464_v18 = vsel %vm226_vm3, %v2770_v17, 0.0  ;;  %v468_v19 = vpack.c.bf16 %v2770_v17, %v2770_v17 }
 0x483   :  { %465 = vadd.xlane.f32.xlu0 %v464_v18 }
 0x484   :  { %2504 = vmatmul.mubr.msk.bf16.vlgmr.msra.gmra.mrb[16].mxu0 %vm226_vm3, %v468_v19 }
 0x485   :  { %v2772_v21 = vpop.eup %2771  ;;  %2520 = vmatpush3.bf16.xpose.msra.mxu0 %v677_v20  ;;  %2521 = vmatprep.mubr.msk.bf16.mxu0 %vm2931_vm0, %v2930_v0 }
 0x486   :  { %v461_v22 = vsel %vm226_vm3, %v2772_v21, 0.0  ;;  %v467_v24 = vpack.c.bf16 %v2772_v21, %v2772_v21  ;;  %2525 = vmatprep.subr.bf16.mxu0 %v2930_v0 }
 0x487   :  { %462 = vadd.xlane.f32.xlu1 %v461_v22  ;;  %240 = vadd.xlane.f32.xlu0 %v239_v23  ;;  %v3180_v22 = vld [vmem:[#allocation7 + $0x4] sm:$0xf] }
 0x488   :  { %2498 = vmatmul.mubr.msk.bf16.vlgmr.msra.gmra.mrb[12].mxu1 %vm226_vm3, %v467_v24  ;;  %v894_v23 = vsel %vm577_vm5, %v3180_v22, 0 }
 0x489   :  { %2509 = vmatprep.mubr.msk.bf16.mxu1 %vm2931_vm0, %v2930_v0  ;;  %2508 = vmatpush3.bf16.msra.mxu1 %v579_v30 }
 0x48a   :  { %2513 = vmatprep.subr.bf16.mxu1 %v2930_v0 }
 0x48b   :  { %243 = vadd.xlane.f32.xlu0 %v242_v25 }
 0x48c   :  { %2522 = vmatmul.mubr.msk.bf16.vlgmr.msra.gmra.mrb[20].mxu0 %vm130_vm2, %v670_v12 }
 0x48d   :  { %2526 = vmatpush3.bf16.xpose.msra.mxu0 %v727_v26  ;;  %2527 = vmatprep.mubr.msk.bf16.mxu0 %vm2931_vm0, %v2930_v0 }
 0x48e   :  { %2537 = vmatprep.subr.bf16.mxu0 %v2930_v0 }
 0x494   :  { %2528 = vmatmul.mubr.msk.bf16.vlgmr.msra.gmra.mrb[24].mxu0 %vm130_vm2, %v720_v5 }
 0x495   :  { %2539 = vmatprep.mubr.msk.bf16.mxu0 %vm2931_vm0, %v2930_v0 }
 0x510   :  { %v466_v31 = vpop.xlane.xlu0 %465 }
 0x514   :  { %v241_v32 = vpop.xlane.xlu0 %240  ;;  %v463_v39 = vpop.xlane.xlu1 %462 }
 0x515   :  { %2773 = vrcp.f32 %v241_v32 }
 0x518   :  { %v244_v33 = vpop.xlane.xlu0 %243 }
 0x519   :  { %2775 = vrcp.f32 %v244_v33 }
 0x51a   :  { %2777 = vrcp.f32 %v466_v31 }
 0x51b   :  { %2779 = vrcp.f32 %v463_v39 }
 0x51f   :  { %v2774_v34 = vpop.eup %2773 }
 0x520   :  { %v346_v36 = vmul.f32 %v2774_v34, %v3101_v52  ;;  %v626_v52 = vsel %vm577_vm5, %v64_v27, 0 }
 0x523   :  { %v2776_v35 = vpop.eup %2775 }
 0x524   :  { %v347_v37 = vmul.f32 %v2776_v35, %v3099_v48  ;;  %v2778_v43 = vpop.eup %2777 }
 0x525   :  { %v2780_v45 = vpop.eup %2779 }
 0x526   :  { %v348_v38 = vpack.c.bf16 %v347_v37, %v346_v36 }
 0x557   :  { %v559_v40 = vpop.f32.mrb[16].mxu0 }
 0x558   :  { %v2505_v41 = vpop.f32.mrb[17].mxu0  ;;  %v568_v47 = vmul.f32 %v2778_v43, %v559_v40 }
 0x559   :  { %v562_v42 = vpop.f32.mrb[18].mxu0 }
 0x55a   :  { %v2506_v44 = vpop.f32.mrb[19].mxu0 }
 0x55b   :  { %v511_v46 = vpop.f32.mrb[12].mxu1 }
 0x55c   :  { %v567_v49 = vmul.f32 %v2780_v45, %v511_v46  ;;  %v2499_v50 = vpop.f32.mrb[13].mxu1 }
 0x55d   :  { %v514_v51 = vpop.f32.mrb[14].mxu1 }
 0x55e   :  { %v569_v53 = vpack.c.bf16 %v568_v47, %v567_v49  ;;  %v2500_v54 = vpop.f32.mrb[15].mxu1 }
 0x55f   :  { %v713_v48 = vpop.f32.mrb[20].mxu0 }
 0x560   :  { %2510 = vmatmul.mubr.msk.bf16.vlgmr.msra.gmra.mrb[16].mxu1 %vm130_vm2, %v569_v53  ;;  %v2523_v55 = vpop.f32.mrb[21].mxu0  ;;  %v769_v56 = vsel %vm226_vm3, %v713_v48, -inf }
 0x561   :  { %770 = vmax.xlane.f32.xlu0 %v769_v56  ;;  %v716_v57 = vpop.f32.mrb[22].mxu0  ;;  %2514 = vmatpush3.bf16.msra.mxu1 %v626_v52 }
 0x562   :  { %v2524_v58 = vpop.f32.mrb[23].mxu0  ;;  %2515 = vmatprep.mubr.msk.bf16.mxu1 %vm2931_vm0, %v2930_v0  ;;  %2531 = vmatprep.subr.bf16.mxu1 %v2930_v0 }
 0x567   :  { %v763_v59 = vpop.f32.mrb[24].mxu0 }
 0x568   :  { %v2529_v60 = vpop.f32.mrb[25].mxu0  ;;  %v772_v61 = vsel %vm226_vm3, %v763_v59, -inf }
 0x569   :  { %773 = vmax.xlane.f32.xlu1 %v772_v61  ;;  %v766_v62 = vpop.f32.mrb[26].mxu0 }
 0x56a   :  { %v2530_v63 = vpop.f32.mrb[27].mxu0 }
 0x56c   :  { %2516 = vmatmul.mubr.msk.bf16.vlgmr.msra.gmra.mrb[16].mxu1 %vm130_vm2, %v348_v38 }
 0x56d   :  { %2533 = vmatprep.mubr.msk.bf16.mxu1 %vm2931_vm0, %v2930_v0 }
 0x577   :  { %789 = vrot.lane.b32.xlu0 %v3034_v11, %s2938_s22 }
 0x57a   :  { %837 = vrot.lane.b32.xlu1 %v3031_v9, %s2938_s22 }
 0x57b   :  { %939 = vrot.lane.b32.xlu0 %v3034_v11, %s2939_s29 }
 0x57e   :  { %941 = vrot.lane.b32.xlu1 %v3034_v11, %s2940_s30 }
 0x5ee   :  { %v771_v1 = vpop.xlane.xlu0 %770 }
 0x5ef   :  { %v775_v2 = vsub.f32 %v713_v48, %v771_v1 }
 0x5f1   :  { %v777_v3 = vmul.f32 1.442695, %v775_v2 }
 0x5f2   :  { %v790_v4 = vpop.permute.xlu0 %789 }
 0x5f3   :  { %2781 = vpow2.f32 %v777_v3  ;;  %v795_v5 = vsel %vm252_vm4, %v790_v4, 0 }
 0x5f4   :  { %2532 = vmatpush3.bf16.msra.mxu1 %v795_v5 }
 0x5f5   :  { %2543 = vmatprep.subr.bf16.mxu1 %v2930_v0 }
 0x5f6   :  { %v774_v6 = vpop.xlane.xlu1 %773  ;;  %v940_v21 = vpop.permute.xlu0 %939 }
 0x5f7   :  { %v776_v7 = vsub.f32 %v763_v59, %v774_v6 }
 0x5f9   :  { %v779_v8 = vmul.f32 1.442695, %v776_v7 }
 0x5fa   :  { %v838_v10 = vpop.permute.xlu1 %837 }
 0x5fb   :  { %2783 = vpow2.f32 %v779_v8  ;;  %v843_v12 = vsel %vm252_vm4, %v838_v10, 0 }
 0x5fc   :  { %2538 = vmatpush3.bf16.msra.mxu0 %v843_v12 }
 0x5fd   :  { %v2782_v13 = vpop.eup %2781  ;;  %2549 = vmatprep.subr.bf16.mxu0 %v2930_v0 }
 0x5fe   :  { %v781_v14 = vsel %vm226_vm3, %v2782_v13, 0.0  ;;  %v787_v15 = vpack.c.bf16 %v2782_v13, %v2782_v13  ;;  %v942_v17 = vpop.permute.xlu1 %941 }
 0x5ff   :  { %782 = vadd.xlane.f32.xlu1 %v781_v14  ;;  %v947_v20 = vsel %vm130_vm2, %v942_v17, 0 }
 0x600   :  { %2534 = vmatmul.mubr.msk.bf16.vlgmr.msra.gmra.mrb[20].mxu1 %vm226_vm3, %v787_v15 }
 0x601   :  { %2545 = vmatprep.mubr.msk.bf16.mxu1 %vm2931_vm0, %v2930_v0  ;;  %2544 = vmatpush3.bf16.msra.mxu1 %v894_v23 }
 0x602   :  { %2555 = vmatprep.subr.bf16.mxu1 %v2930_v0 }
 0x605   :  { %v2784_v16 = vpop.eup %2783 }
 0x606   :  { %v784_v18 = vsel %vm226_vm3, %v2784_v16, 0.0  ;;  %v788_v19 = vpack.c.bf16 %v2784_v16, %v2784_v16 }
 0x607   :  { %785 = vadd.xlane.f32.xlu0 %v784_v18 }
 0x608   :  { %2540 = vmatmul.mubr.msk.bf16.vlgmr.msra.gmra.mrb[28].mxu0 %vm226_vm3, %v788_v19 }
 0x609   :  { %2550 = vmatpush3.bf16.xpose.msra.mxu0 %v947_v20  ;;  %2551 = vmatprep.mubr.msk.bf16.mxu0 %vm2931_vm0, %v2930_v0 }
 0x60a   :  { %2561 = vmatprep.subr.bf16.mxu0 %v2930_v0 }
 0x610   :  { %989 = vrot.lane.b32.xlu1 %v3031_v9, %s2939_s29  ;;  %2552 = vmatmul.mubr.msk.bf16.vlgmr.msra.gmra.mrb[32].mxu0 %vm130_vm2, %v940_v21 }
 0x611   :  { %2563 = vmatprep.mubr.msk.bf16.mxu0 %vm2931_vm0, %v2930_v0 }
 0x61d   :  { %991 = vrot.lane.b32.xlu0 %v3031_v9, %s2940_s30 }
 0x621   :  { %1059 = vrot.lane.b32.xlu0 %v3034_v11, %s2941_s4 }
 0x625   :  { %1215 = vrot.lane.b32.xlu0 %v3034_v11, %s2942_s5 }
 0x629   :  { %1213 = vrot.lane.b32.xlu0 %v3034_v11, %s2943_s6 }
 0x62d   :  { %1265 = vrot.lane.b32.xlu0 %v3031_v9, %s2942_s5 }
 0x631   :  { %1263 = vrot.lane.b32.xlu0 %v3031_v9, %s2943_s6 }
 0x68c   :  { %v783_v28 = vpop.xlane.xlu1 %782 }
 0x68d   :  { %2785 = vrcp.f32 %v783_v28  ;;  %v2344_v28 = vcombine.low %v3180_v22, %v3180_v22 }
 0x690   :  { %v990_v49 = vpop.permute.xlu1 %989 }
 0x694   :  { %v786_v24 = vpop.xlane.xlu0 %785 }
 0x695   :  { %2787 = vrcp.f32 %v786_v24 }
 0x697   :  { %v2786_v33 = vpop.eup %2785 }
 0x698   :  { %v992_v25 = vpop.permute.xlu0 %991 }
 0x699   :  { %v997_v42 = vsel %vm130_vm2, %v992_v25, 0 }
 0x69c   :  { %v1060_v26 = vpop.permute.xlu0 %1059 }
 0x69d   :  { %v1065_v27 = vsel %vm252_vm4, %v1060_v26, 0 }
 0x69e   :  { %2562 = vmatpush3.bf16.msra.mxu0 %v1065_v27 }
 0x69f   :  { %2579 = vmatprep.subr.bf16.mxu0 %v2930_v0  ;;  %v2788_v34 = vpop.eup %2787 }
 0x6a0   :  { %v1216_v48 = vpop.permute.xlu0 %1215 }
 0x6a1   :  { %v1221_v59 = vsel %vm130_vm2, %v1216_v48, 0 }
 0x6a4   :  { %v1214_v58 = vpop.permute.xlu0 %1213 }
 0x6a8   :  { %v1266_v60 = vpop.permute.xlu0 %1265 }
 0x6a9   :  { %v1271_v61 = vsel %vm130_vm2, %v1266_v60, 0  ;;  %v3264_v60 = vld [vmem:[#allocation7 + $0x8] sm:$0xf] }
 0x6ac   :  { %v1264_v62 = vpop.permute.xlu0 %1263 }
 0x6d3   :  { %v831_v29 = vpop.f32.mrb[20].mxu1 }
 0x6d4   :  { %v2535_v30 = vpop.f32.mrb[21].mxu1  ;;  %v887_v36 = vmul.f32 %v2786_v33, %v831_v29  ;;  %v1163_v29 = vrot.slane %v2344_v28, 2 }
 0x6d5   :  { %v834_v31 = vpop.f32.mrb[22].mxu1 }
 0x6d6   :  { %v2536_v32 = vpop.f32.mrb[23].mxu1  ;;  %v1168_v30 = vsel %vm577_vm5, %v1163_v29, 0 }
 0x6db   :  { %v879_v35 = vpop.f32.mrb[28].mxu0 }
 0x6dc   :  { %v888_v37 = vmul.f32 %v2788_v34, %v879_v35  ;;  %v2541_v38 = vpop.f32.mrb[29].mxu0 }
 0x6dd   :  { %v882_v39 = vpop.f32.mrb[30].mxu0 }
 0x6de   :  { %v889_v40 = vpack.c.bf16 %v888_v37, %v887_v36  ;;  %v2542_v41 = vpop.f32.mrb[31].mxu0 }
 0x6e0   :  { %2546 = vmatmul.mubr.msk.bf16.vlgmr.msra.gmra.mrb[16].mxu1 %vm130_vm2, %v889_v40 }
 0x6e1   :  { %2556 = vmatpush3.bf16.xpose.msra.mxu1 %v997_v42  ;;  %2557 = vmatprep.mubr.msk.bf16.mxu1 %vm2931_vm0, %v2930_v0 }
 0x6e2   :  { %2567 = vmatprep.subr.bf16.mxu1 %v2930_v0 }
 0x6e3   :  { %v983_v43 = vpop.f32.mrb[32].mxu0 }
 0x6e4   :  { %v2553_v44 = vpop.f32.mrb[33].mxu0  ;;  %v1039_v45 = vsel %vm226_vm3, %v983_v43, -inf }
 0x6e5   :  { %1040 = vmax.xlane.f32.xlu1 %v1039_v45  ;;  %v986_v46 = vpop.f32.mrb[34].mxu0 }
 0x6e6   :  { %v2554_v47 = vpop.f32.mrb[35].mxu0 }
 0x6e8   :  { %2558 = vmatmul.mubr.msk.bf16.vlgmr.msra.gmra.mrb[24].mxu1 %vm130_vm2, %v990_v49 }
 0x6e9   :  { %2569 = vmatprep.mubr.msk.bf16.mxu1 %vm2931_vm0, %v2930_v0 }
 0x6f6   :  { %1107 = vrot.lane.b32.xlu1 %v3031_v9, %s2941_s4 }
 0x772   :  { %v1041_v50 = vpop.xlane.xlu1 %1040 }
 0x773   :  { %v1045_v51 = vsub.f32 %v983_v43, %v1041_v50 }
 0x775   :  { %v1047_v53 = vmul.f32 1.442695, %v1045_v51 }
 0x776   :  { %v1108_v54 = vpop.permute.xlu1 %1107 }
 0x777   :  { %2789 = vpow2.f32 %v1047_v53  ;;  %v1113_v52 = vsel %vm252_vm4, %v1108_v54, 0 }
 0x778   :  { %2568 = vmatpush3.bf16.msra.mxu1 %v1113_v52 }
 0x779   :  { %2573 = vmatprep.subr.bf16.mxu1 %v2930_v0 }
 0x781   :  { %v2790_v55 = vpop.eup %2789 }
 0x782   :  { %v1051_v56 = vsel %vm226_vm3, %v2790_v55, 0.0  ;;  %v1057_v57 = vpack.c.bf16 %v2790_v55, %v2790_v55 }
 0x783   :  { %1052 = vadd.xlane.f32.xlu1 %v1051_v56 }
 0x784   :  { %2564 = vmatmul.mubr.msk.bf16.vlgmr.msra.gmra.mrb[36].mxu0 %vm226_vm3, %v1057_v57 }
 0x785   :  { %2580 = vmatpush3.bf16.xpose.msra.mxu0 %v1221_v59  ;;  %2581 = vmatprep.mubr.msk.bf16.mxu0 %vm2931_vm0, %v2930_v0 }
 0x786   :  { %2585 = vmatprep.subr.bf16.mxu0 %v2930_v0 }
 0x78c   :  { %2582 = vmatmul.mubr.msk.bf16.vlgmr.msra.gmra.mrb[40].mxu0 %vm130_vm2, %v1214_v58 }
 0x78d   :  { %2586 = vmatpush3.bf16.xpose.msra.mxu0 %v1271_v61  ;;  %2587 = vmatprep.mubr.msk.bf16.mxu0 %vm2931_vm0, %v2930_v0  ;;  %v1438_v61 = vsel %vm577_vm5, %v3264_v60, 0 }
 0x78e   :  { %2597 = vmatprep.subr.bf16.mxu0 %v2930_v0 }
 0x794   :  { %2588 = vmatmul.mubr.msk.bf16.vlgmr.msra.gmra.mrb[44].mxu0 %vm130_vm2, %v1264_v62  ;;  %1485 = vrot.lane.b32.xlu1 %v3034_v11, %s2944_s7 }
 0x795   :  { %2599 = vmatprep.mubr.msk.bf16.mxu0 %vm2931_vm0, %v2930_v0 }
 0x7bb   :  { %v1033_v63 = vpop.f32.mrb[24].mxu1 }
 0x7bc   :  { %v2559_v1 = vpop.f32.mrb[25].mxu1  ;;  %v1042_v2 = vsel %vm226_vm3, %v1033_v63, -inf }
 0x7bd   :  { %1043 = vmax.xlane.f32.xlu0 %v1042_v2  ;;  %v1036_v3 = vpop.f32.mrb[26].mxu1 }
 0x7be   :  { %v2560_v4 = vpop.f32.mrb[27].mxu1 }
 0x7d3   :  { %1333 = vrot.lane.b32.xlu0 %v3034_v11, %s2945_s8 }
 0x810   :  { %v1053_v42 = vpop.xlane.xlu1 %1052 }
 0x814   :  { %v1486_v44 = vpop.permute.xlu1 %1485 }
 0x815   :  { %v1491_v47 = vsel %vm130_vm2, %v1486_v44, 0 }
 0x84a   :  { %v1044_v5 = vpop.xlane.xlu0 %1043 }
 0x84b   :  { %v1046_v6 = vsub.f32 %v1033_v63, %v1044_v5 }
 0x84d   :  { %v1049_v7 = vmul.f32 1.442695, %v1046_v6 }
 0x84e   :  { %v1334_v31 = vpop.permute.xlu0 %1333 }
 0x84f   :  { %2791 = vpow2.f32 %v1049_v7  ;;  %v1339_v58 = vsel %vm252_vm4, %v1334_v31, 0 }
 0x857   :  { %v3218_v8 = vpop.f32.mrb[36].mxu0 }
 0x858   :  { %v2565_v10 = vpop.f32.mrb[37].mxu0 }
 0x859   :  { %v2792_v12 = vpop.eup %2791  ;;  %v1104_v13 = vpop.f32.mrb[38].mxu0 }
 0x85a   :  { %v2566_v14 = vpop.f32.mrb[39].mxu0  ;;  %v1054_v15 = vsel %vm226_vm3, %v2792_v12, 0.0  ;;  %v1058_v16 = vpack.c.bf16 %v2792_v12, %v2792_v12 }
 0x85b   :  { %1055 = vadd.xlane.f32.xlu0 %v1054_v15 }
 0x85c   :  { %2570 = vmatmul.mubr.msk.bf16.vlgmr.msra.gmra.mrb[28].mxu1 %vm226_vm3, %v1058_v16 }
 0x85d   :  { %2575 = vmatprep.mubr.msk.bf16.mxu1 %vm2931_vm0, %v2930_v0  ;;  %2574 = vmatpush3.bf16.msra.mxu1 %v1168_v30 }
 0x85e   :  { %2591 = vmatprep.subr.bf16.mxu1 %v2930_v0 }
 0x85f   :  { %v1257_v17 = vpop.f32.mrb[40].mxu0 }
 0x860   :  { %v2583_v18 = vpop.f32.mrb[41].mxu0  ;;  %v1313_v19 = vsel %vm226_vm3, %v1257_v17, -inf }
 0x861   :  { %1314 = vmax.xlane.f32.xlu0 %v1313_v19  ;;  %v1260_v20 = vpop.f32.mrb[42].mxu0 }
 0x862   :  { %v2584_v21 = vpop.f32.mrb[43].mxu0 }
 0x867   :  { %v1307_v23 = vpop.f32.mrb[44].mxu0 }
 0x868   :  { %v2589_v24 = vpop.f32.mrb[45].mxu0  ;;  %v1316_v25 = vsel %vm226_vm3, %v1307_v23, -inf }
 0x869   :  { %1317 = vmax.xlane.f32.xlu0 %v1316_v25  ;;  %v1310_v26 = vpop.f32.mrb[46].mxu0 }
 0x86a   :  { %v2590_v27 = vpop.f32.mrb[47].mxu0 }
 0x87f   :  { %1381 = vrot.lane.b32.xlu0 %v3031_v9, %s2945_s8 }
 0x883   :  { %1483 = vrot.lane.b32.xlu0 %v3034_v11, %s2946_s10 }
 0x8e8   :  { %v1056_v32 = vpop.xlane.xlu0 %1055 }
 0x8ee   :  { %v1315_v33 = vpop.xlane.xlu0 %1314 }
 0x8ef   :  { %v1319_v34 = vsub.f32 %v1257_v17, %v1315_v33 }
 0x8f1   :  { %v1321_v35 = vmul.f32 1.442695, %v1319_v34 }
 0x8f3   :  { %2793 = vpow2.f32 %v1321_v35 }
 0x8f6   :  { %v1318_v36 = vpop.xlane.xlu0 %1317 }
 0x8f7   :  { %v1320_v37 = vsub.f32 %v1307_v23, %v1318_v36 }
 0x8f9   :  { %v1323_v38 = vmul.f32 1.442695, %v1320_v37 }
 0x8fa   :  { %v1382_v39 = vpop.permute.xlu0 %1381 }
 0x8fb   :  { %2795 = vpow2.f32 %v1323_v38  ;;  %v1387_v40 = vsel %vm252_vm4, %v1382_v39, 0 }
 0x8fc   :  { %2598 = vmatpush3.bf16.msra.mxu0 %v1387_v40  ;;  %2797 = vrcp.f32 %v1053_v42 }
 0x8fd   :  { %v2794_v22 = vpop.eup %2793  ;;  %2609 = vmatprep.subr.bf16.mxu0 %v2930_v0  ;;  %2799 = vrcp.f32 %v1056_v32 }
 0x8fe   :  { %v1325_v41 = vsel %vm226_vm3, %v2794_v22, 0.0  ;;  %v1484_v49 = vpop.permute.xlu0 %1483  ;;  %v1331_v59 = vpack.c.bf16 %v2794_v22, %v2794_v22 }
 0x8ff   :  { %1326 = vadd.xlane.f32.xlu0 %v1325_v41 }
 0x905   :  { %v2796_v43 = vpop.eup %2795 }
 0x906   :  { %v1328_v45 = vsel %vm226_vm3, %v2796_v43, 0.0  ;;  %v1332_v46 = vpack.c.bf16 %v2796_v43, %v2796_v43  ;;  %v2798_v50 = vpop.eup %2797 }
 0x907   :  { %1329 = vadd.xlane.f32.xlu1 %v1328_v45  ;;  %v2800_v51 = vpop.eup %2799  ;;  %v1157_v54 = vmul.f32 %v2798_v50, %v3218_v8 }
 0x908   :  { %2600 = vmatmul.mubr.msk.bf16.vlgmr.msra.gmra.mrb[48].mxu0 %vm226_vm3, %v1332_v46 }
 0x909   :  { %2610 = vmatpush3.bf16.xpose.msra.mxu0 %v1491_v47  ;;  %2611 = vmatprep.mubr.msk.bf16.mxu0 %vm2931_vm0, %v2930_v0 }
 0x90a   :  { %2621 = vmatprep.subr.bf16.mxu0 %v2930_v0 }
 0x910   :  { %2612 = vmatmul.mubr.msk.bf16.vlgmr.msra.gmra.mrb[52].mxu0 %vm130_vm2, %v1484_v49 }
 0x911   :  { %2623 = vmatprep.mubr.msk.bf16.mxu0 %vm2931_vm0, %v2930_v0 }
 0x915   :  { %1535 = vrot.lane.b32.xlu0 %v3031_v9, %s2944_s7 }
 0x918   :  { %1533 = vrot.lane.b32.xlu1 %v3031_v9, %s2946_s10 }
 0x91c   :  { %1603 = vrot.lane.b32.xlu1 %v3034_v11, %s2947_s11 }
 0x920   :  { %1759 = vrot.lane.b32.xlu1 %v3034_v11, %s2948_s12 }
 0x924   :  { %1757 = vrot.lane.b32.xlu1 %v3034_v11, %s2949_s13 }
 0x928   :  { %1809 = vrot.lane.b32.xlu1 %v3031_v9, %s2948_s12 }
 0x92c   :  { %1807 = vrot.lane.b32.xlu1 %v3031_v9, %s2949_s13 }
 0x92f   :  { %v1149_v53 = vpop.f32.mrb[28].mxu1 }
 0x930   :  { %v1158_v52 = vmul.f32 %v2800_v51, %v1149_v53  ;;  %v2571_v48 = vpop.f32.mrb[29].mxu1 }
 0x931   :  { %v1152_v55 = vpop.f32.mrb[30].mxu1 }
 0x932   :  { %v1159_v56 = vpack.c.bf16 %v1158_v52, %v1157_v54  ;;  %v2572_v57 = vpop.f32.mrb[31].mxu1 }
 0x934   :  { %2576 = vmatmul.mubr.msk.bf16.vlgmr.msra.gmra.mrb[16].mxu1 %vm130_vm2, %v1159_v56 }
 0x935   :  { %2592 = vmatpush3.bf16.msra.mxu1 %v1339_v58  ;;  %2593 = vmatprep.mubr.msk.bf16.mxu1 %vm2931_vm0, %v2930_v0 }
 0x936   :  { %2603 = vmatprep.subr.bf16.mxu1 %v2930_v0 }
 0x93c   :  { %2594 = vmatmul.mubr.msk.bf16.vlgmr.msra.gmra.mrb[32].mxu1 %vm226_vm3, %v1331_v59 }
 0x93d   :  { %2605 = vmatprep.mubr.msk.bf16.mxu1 %vm2931_vm0, %v2930_v0  ;;  %2604 = vmatpush3.bf16.msra.mxu1 %v1438_v61 }
 0x93e   :  { %2615 = vmatprep.subr.bf16.mxu1 %v2930_v0 }
 0x98c   :  { %v1327_v16 = vpop.xlane.xlu0 %1326 }
 0x990   :  { %v1536_v21 = vpop.permute.xlu0 %1535 }
 0x991   :  { %v1541_v26 = vsel %vm130_vm2, %v1536_v21, 0 }
 0x994   :  { %v1330_v62 = vpop.xlane.xlu1 %1329 }
 0x995   :  { %2801 = vrcp.f32 %v1330_v62 }
 0x996   :  { %2803 = vrcp.f32 %v1327_v16 }
 0x998   :  { %v1534_v63 = vpop.permute.xlu1 %1533 }
 0x99c   :  { %v1604_v1 = vpop.permute.xlu1 %1603 }
 0x99d   :  { %v1609_v2 = vsel %vm252_vm4, %v1604_v1, 0 }
 0x99e   :  { %2622 = vmatpush3.bf16.msra.mxu0 %v1609_v2 }
 0x99f   :  { %2639 = vmatprep.subr.bf16.mxu0 %v2930_v0  ;;  %v2802_v3 = vpop.eup %2801 }
 0x9a0   :  { %v2804_v17 = vpop.eup %2803  ;;  %v1760_v32 = vpop.permute.xlu1 %1759 }
 0x9a1   :  { %v1765_v37 = vsel %vm130_vm2, %v1760_v32, 0 }
 0x9a4   :  { %v1758_v36 = vpop.permute.xlu1 %1757 }
 0x9a8   :  { %v1810_v38 = vpop.permute.xlu1 %1809 }
 0x9a9   :  { %v1815_v39 = vsel %vm130_vm2, %v1810_v38, 0 }
 0x9ac   :  { %v1808_v40 = vpop.permute.xlu1 %1807 }
 0x9db   :  { %v1423_v4 = vpop.f32.mrb[48].mxu0 }
 0x9dc   :  { %v1432_v5 = vmul.f32 %v2802_v3, %v1423_v4  ;;  %v2601_v6 = vpop.f32.mrb[49].mxu0 }
 0x9dd   :  { %v1426_v7 = vpop.f32.mrb[50].mxu0 }
 0x9de   :  { %v2602_v8 = vpop.f32.mrb[51].mxu0 }
 0x9df   :  { %v2355_v8 = vcombine.low %v3264_v60, %v3264_v60 }
 0x9e3   :  { %v1527_v10 = vpop.f32.mrb[52].mxu0 }
 0x9e4   :  { %v2613_v12 = vpop.f32.mrb[53].mxu0  ;;  %v1583_v13 = vsel %vm226_vm3, %v1527_v10, -inf }
 0x9e5   :  { %1584 = vmax.xlane.f32.xlu0 %v1583_v13  ;;  %v1530_v14 = vpop.f32.mrb[54].mxu0 }
 0x9e6   :  { %v2614_v15 = vpop.f32.mrb[55].mxu0 }
 0x9fb   :  { %1651 = vrot.lane.b32.xlu0 %v3031_v9, %s2947_s11 }
 0xa0f   :  { %v1375_v18 = vpop.f32.mrb[32].mxu1 }
 0xa10   :  { %v1431_v19 = vmul.f32 %v2804_v17, %v1375_v18  ;;  %v2595_v20 = vpop.f32.mrb[33].mxu1 }
 0xa11   :  { %v1378_v23 = vpop.f32.mrb[34].mxu1 }
 0xa12   :  { %v1433_v24 = vpack.c.bf16 %v1432_v5, %v1431_v19  ;;  %v2596_v25 = vpop.f32.mrb[35].mxu1 }
 0xa14   :  { %2606 = vmatmul.mubr.msk.bf16.vlgmr.msra.gmra.mrb[16].mxu1 %vm130_vm2, %v1433_v24 }
 0xa15   :  { %2616 = vmatpush3.bf16.xpose.msra.mxu1 %v1541_v26  ;;  %2617 = vmatprep.mubr.msk.bf16.mxu1 %vm2931_vm0, %v2930_v0 }
 0xa16   :  { %2627 = vmatprep.subr.bf16.mxu1 %v2930_v0 }
 0xa1c   :  { %2618 = vmatmul.mubr.msk.bf16.vlgmr.msra.gmra.mrb[36].mxu1 %vm130_vm2, %v1534_v63 }
 0xa1d   :  { %2629 = vmatprep.mubr.msk.bf16.mxu1 %vm2931_vm0, %v2930_v0 }
 0xa72   :  { %v1585_v27 = vpop.xlane.xlu0 %1584 }
 0xa73   :  { %v1589_v28 = vsub.f32 %v1527_v10, %v1585_v27  ;;  %v1707_v10 = vrot.slane %v2355_v8, 2 }
 0xa75   :  { %v1591_v29 = vmul.f32 1.442695, %v1589_v28  ;;  %v1712_v12 = vsel %vm577_vm5, %v1707_v10, 0 }
 0xa76   :  { %v1652_v30 = vpop.permute.xlu0 %1651 }
 0xa77   :  { %2805 = vpow2.f32 %v1591_v29  ;;  %v1657_v31 = vsel %vm252_vm4, %v1652_v30, 0 }
 0xa78   :  { %2628 = vmatpush3.bf16.msra.mxu1 %v1657_v31 }
 0xa79   :  { %2633 = vmatprep.subr.bf16.mxu1 %v2930_v0 }
 0xa81   :  { %v2806_v33 = vpop.eup %2805 }
 0xa82   :  { %v1595_v34 = vsel %vm226_vm3, %v2806_v33, 0.0  ;;  %v1601_v35 = vpack.c.bf16 %v2806_v33, %v2806_v33 }
 0xa83   :  { %1596 = vadd.xlane.f32.xlu0 %v1595_v34 }
 0xa84   :  { %2624 = vmatmul.mubr.msk.bf16.vlgmr.msra.gmra.mrb[56].mxu0 %vm226_vm3, %v1601_v35 }
 0xa85   :  { %2640 = vmatpush3.bf16.xpose.msra.mxu0 %v1765_v37  ;;  %2641 = vmatprep.mubr.msk.bf16.mxu0 %vm2931_vm0, %v2930_v0 }
 0xa86   :  { %2645 = vmatprep.subr.bf16.mxu0 %v2930_v0 }
 0xa8c   :  { %2642 = vmatmul.mubr.msk.bf16.vlgmr.msra.gmra.mrb[60].mxu0 %vm130_vm2, %v1758_v36  ;;  %v3334_v36 = vld [vmem:[#allocation7 + $0xc] sm:$0xf] }
 0xa8d   :  { %2646 = vmatpush3.bf16.xpose.msra.mxu0 %v1815_v39  ;;  %2647 = vmatprep.mubr.msk.bf16.mxu0 %vm2931_vm0, %v2930_v0  ;;  %v1982_v38 = vsel %vm577_vm5, %v3334_v36, 0 }
 0xa8e   :  { %2657 = vmatprep.subr.bf16.mxu0 %v2930_v0 }
 0xa94   :  { %2648 = vmatmul.mubr.msk.bf16.vlgmr.msra.gmra.mrb[64].mxu0 %vm130_vm2, %v1808_v40 }
 0xa95   :  { %2659 = vmatprep.mubr.msk.bf16.mxu0 %vm2931_vm0, %v2930_v0 }
 0xa99   :  { %1925 = vrot.lane.b32.xlu0 %v3031_v9, %s2950_s14 }
 0xaef   :  { %v1577_v22 = vpop.f32.mrb[36].mxu1 }
 0xaf0   :  { %v2619_v41 = vpop.f32.mrb[37].mxu1  ;;  %v1586_v42 = vsel %vm226_vm3, %v1577_v22, -inf }
 0xaf1   :  { %1587 = vmax.xlane.f32.xlu1 %v1586_v42  ;;  %v1580_v43 = vpop.f32.mrb[38].mxu1 }
 0xaf2   :  { %v2620_v44 = vpop.f32.mrb[39].mxu1 }
 0xb10   :  { %v1597_v45 = vpop.xlane.xlu0 %1596 }
 0xb11   :  { %2807 = vrcp.f32 %v1597_v45 }
 0xb14   :  { %v1926_v46 = vpop.permute.xlu0 %1925 }
 0xb15   :  { %v1931_v47 = vsel %vm252_vm4, %v1926_v46, 0 }
 0xb16   :  { %2658 = vmatpush3.bf16.msra.mxu0 %v1931_v47 }
 0xb17   :  { %2669 = vmatprep.subr.bf16.mxu0 %v2930_v0 }
 0xb1b   :  { %v2808_v49 = vpop.eup %2807 }
 0xb57   :  { %v1645_v50 = vpop.f32.mrb[56].mxu0 }
 0xb58   :  { %v3303_v51 = vmul.f32 %v2808_v49, %v1645_v50  ;;  %v2625_v53 = vpop.f32.mrb[57].mxu0 }
 0xb59   :  { %v1648_v54 = vpop.f32.mrb[58].mxu0 }
 0xb5a   :  { %v2626_v52 = vpop.f32.mrb[59].mxu0 }
 0xb5f   :  { %v1801_v48 = vpop.f32.mrb[60].mxu0 }
 0xb60   :  { %v2643_v55 = vpop.f32.mrb[61].mxu0  ;;  %v1857_v56 = vsel %vm226_vm3, %v1801_v48, -inf }
 0xb61   :  { %1858 = vmax.xlane.f32.xlu1 %v1857_v56  ;;  %v1804_v57 = vpop.f32.mrb[62].mxu0 }
 0xb62   :  { %v2644_v58 = vpop.f32.mrb[63].mxu0 }
 0xb67   :  { %v1851_v59 = vpop.f32.mrb[64].mxu0 }
 0xb68   :  { %v2649_v61 = vpop.f32.mrb[65].mxu0  ;;  %v1860_v62 = vsel %vm226_vm3, %v1851_v59, -inf }
 0xb69   :  { %1861 = vmax.xlane.f32.xlu1 %v1860_v62  ;;  %v1854_v63 = vpop.f32.mrb[66].mxu0 }
 0xb6a   :  { %v2650_v1 = vpop.f32.mrb[67].mxu0 }
 0xb7e   :  { %v1588_v2 = vpop.xlane.xlu1 %1587 }
 0xb7f   :  { %v1590_v3 = vsub.f32 %v1577_v22, %v1588_v2 }
 0xb81   :  { %v1593_v4 = vmul.f32 1.442695, %v1590_v3 }
 0xb83   :  { %2809 = vpow2.f32 %v1593_v4 }
 0xb8d   :  { %v2810_v5 = vpop.eup %2809 }
 0xb8e   :  { %v1598_v6 = vsel %vm226_vm3, %v2810_v5, 0.0  ;;  %v1602_v7 = vpack.c.bf16 %v2810_v5, %v2810_v5 }
 0xb8f   :  { %1599 = vadd.xlane.f32.xlu1 %v1598_v6 }
 0xb90   :  { %2630 = vmatmul.mubr.msk.bf16.vlgmr.msra.gmra.mrb[40].mxu1 %vm226_vm3, %v1602_v7 }
 0xb91   :  { %2635 = vmatprep.mubr.msk.bf16.mxu1 %vm2931_vm0, %v2930_v0  ;;  %2634 = vmatpush3.bf16.msra.mxu1 %v1712_v12 }
 0xb92   :  { %2651 = vmatprep.subr.bf16.mxu1 %v2930_v0 }
 0xba0   :  { %1877 = vrot.lane.b32.xlu1 %v3034_v11, %s2950_s14 }
 0xba4   :  { %2029 = vrot.lane.b32.xlu1 %v3034_v11, %s2951_s15 }
 0xbee   :  { %v1859_v13 = vpop.xlane.xlu1 %1858 }
 0xbef   :  { %v1863_v14 = vsub.f32 %v1801_v48, %v1859_v13 }
 0xbf1   :  { %v1865_v15 = vmul.f32 1.442695, %v1863_v14 }
 0xbf3   :  { %2811 = vpow2.f32 %v1865_v15 }
 0xbf6   :  { %v1862_v16 = vpop.xlane.xlu1 %1861 }
 0xbf7   :  { %v1864_v17 = vsub.f32 %v1851_v59, %v1862_v16 }
 0xbf9   :  { %v1867_v18 = vmul.f32 1.442695, %v1864_v17 }
 0xbfb   :  { %2813 = vpow2.f32 %v1867_v18 }
 0xbfd   :  { %v2812_v19 = vpop.eup %2811 }
 0xbfe   :  { %v1869_v60 = vsel %vm226_vm3, %v2812_v19, 0.0  ;;  %v1875_v37 = vpack.c.bf16 %v2812_v19, %v2812_v19 }
 0xbff   :  { %1870 = vadd.xlane.f32.xlu1 %v1869_v60 }
 0xc05   :  { %v2814_v20 = vpop.eup %2813 }
 0xc06   :  { %v1872_v21 = vsel %vm226_vm3, %v2814_v20, 0.0  ;;  %v1876_v23 = vpack.c.bf16 %v2814_v20, %v2814_v20 }
 0xc07   :  { %1873 = vadd.xlane.f32.xlu0 %v1872_v21 }
 0xc08   :  { %2660 = vmatmul.mubr.msk.bf16.vlgmr.msra.gmra.mrb[68].mxu0 %vm226_vm3, %v1876_v23 }
 0xc09   :  { %2671 = vmatprep.mubr.msk.bf16.mxu0 %vm2931_vm0, %v2930_v0 }
 0xc10   :  { %2027 = vrot.lane.b32.xlu1 %v3034_v11, %s2952_s16 }
 0xc14   :  { %2077 = vrot.lane.b32.xlu1 %v3031_v9, %s2952_s16 }
 0xc1c   :  { %v1600_v24 = vpop.xlane.xlu1 %1599 }
 0xc1d   :  { %2079 = vrot.lane.b32.xlu0 %v3031_v9, %s2951_s15  ;;  %2815 = vrcp.f32 %v1600_v24 }
 0xc20   :  { %v1878_v25 = vpop.permute.xlu1 %1877 }
 0xc21   :  { %v1883_v35 = vsel %vm252_vm4, %v1878_v25, 0 }
 0xc24   :  { %v2030_v26 = vpop.permute.xlu1 %2029 }
 0xc25   :  { %v2035_v27 = vsel %vm130_vm2, %v2030_v26, 0 }
 0xc26   :  { %2670 = vmatpush3.bf16.xpose.msra.mxu0 %v2035_v27 }
 0xc27   :  { %2681 = vmatprep.subr.bf16.mxu0 %v2930_v0  ;;  %v2816_v28 = vpop.eup %2815 }
 0xc63   :  { %v1693_v29 = vpop.f32.mrb[40].mxu1 }
 0xc64   :  { %v1702_v30 = vmul.f32 %v2816_v28, %v1693_v29  ;;  %v2631_v31 = vpop.f32.mrb[41].mxu1 }
 0xc65   :  { %v1696_v32 = vpop.f32.mrb[42].mxu1 }
 0xc66   :  { %v1703_v33 = vpack.c.bf16 %v1702_v30, %v3303_v51  ;;  %v2632_v34 = vpop.f32.mrb[43].mxu1 }
 0xc68   :  { %2636 = vmatmul.mubr.msk.bf16.vlgmr.msra.gmra.mrb[16].mxu1 %vm130_vm2, %v1703_v33 }
 0xc69   :  { %2652 = vmatpush3.bf16.msra.mxu1 %v1883_v35  ;;  %2653 = vmatprep.mubr.msk.bf16.mxu1 %vm2931_vm0, %v2930_v0 }
 0xc6a   :  { %2663 = vmatprep.subr.bf16.mxu1 %v2930_v0 }
 0xc70   :  { %2654 = vmatmul.mubr.msk.bf16.vlgmr.msra.gmra.mrb[44].mxu1 %vm226_vm3, %v1875_v37 }
 0xc71   :  { %2664 = vmatpush3.bf16.msra.mxu1 %v1982_v38  ;;  %2665 = vmatprep.mubr.msk.bf16.mxu1 %vm2931_vm0, %v2930_v0 }
 0xc72   :  { %2675 = vmatprep.subr.bf16.mxu1 %v2930_v0 }
 0xc8c   :  { %v1871_v39 = vpop.xlane.xlu1 %1870 }
 0xc8d   :  { %2817 = vrcp.f32 %v1871_v39 }
 0xc90   :  { %v2028_v40 = vpop.permute.xlu1 %2027 }
 0xc91   :  { %2672 = vmatmul.mubr.msk.bf16.vlgmr.msra.gmra.mrb[72].mxu0 %vm130_vm2, %v2028_v40 }
 0xc92   :  { %2683 = vmatprep.mubr.msk.bf16.mxu0 %vm2931_vm0, %v2930_v0 }
 0xc94   :  { %v1874_v44 = vpop.xlane.xlu0 %1873  ;;  %v2078_v56 = vpop.permute.xlu1 %2077 }
 0xc95   :  { %2819 = vrcp.f32 %v1874_v44 }
 0xc97   :  { %v2818_v45 = vpop.eup %2817 }
 0xc98   :  { %v2080_v53 = vpop.permute.xlu0 %2079 }
 0xc99   :  { %v2085_v55 = vsel %vm130_vm2, %v2080_v53, 0 }
 0xc9f   :  { %v2820_v46 = vpop.eup %2819 }
 0xcdb   :  { %v1967_v22 = vpop.f32.mrb[68].mxu0 }
 0xcdc   :  { %v2661_v41 = vpop.f32.mrb[69].mxu0  ;;  %v1976_v49 = vmul.f32 %v2820_v46, %v1967_v22 }
 0xcdd   :  { %v1970_v42 = vpop.f32.mrb[70].mxu0 }
 0xcde   :  { %v2662_v43 = vpop.f32.mrb[71].mxu0 }
 0xd43   :  { %v1919_v47 = vpop.f32.mrb[44].mxu1 }
 0xd44   :  { %v1975_v50 = vmul.f32 %v2818_v45, %v1919_v47  ;;  %v2655_v51 = vpop.f32.mrb[45].mxu1 }
 0xd45   :  { %v1922_v54 = vpop.f32.mrb[46].mxu1 }
 0xd46   :  { %v1977_v52 = vpack.c.bf16 %v1976_v49, %v1975_v50  ;;  %v2656_v48 = vpop.f32.mrb[47].mxu1 }
 0xd48   :  { %2666 = vmatmul.mubr.msk.bf16.vlgmr.msra.gmra.mrb[16].mxu1 %vm130_vm2, %v1977_v52 }
 0xd49   :  { %2676 = vmatpush3.bf16.xpose.msra.mxu1 %v2085_v55  ;;  %2677 = vmatprep.mubr.msk.bf16.mxu1 %vm2931_vm0, %v2930_v0 }
 0xd4a   :  { %2687 = vmatprep.subr.bf16.mxu1 %v2930_v0 }
 0xd50   :  { %2678 = vmatmul.mubr.msk.bf16.vlgmr.msra.gmra.mrb[48].mxu1 %vm130_vm2, %v2078_v56 }
 0xd51   :  { %2689 = vmatprep.mubr.msk.bf16.mxu1 %vm2931_vm0, %v2930_v0 }
 0xd64   :  { %v2071_v57 = vpop.f32.mrb[72].mxu0 }
 0xd65   :  { %v2673_v58 = vpop.f32.mrb[73].mxu0  ;;  %v2127_v59 = vsel %vm226_vm3, %v2071_v57, -inf }
 0xd66   :  { %2128 = vmax.xlane.f32.xlu1 %v2127_v59  ;;  %v2074_v61 = vpop.f32.mrb[74].mxu0 }
 0xd67   :  { %v2674_v62 = vpop.f32.mrb[75].mxu0 }
 0xd77   :  { %2195 = vrot.lane.b32.xlu1 %v3031_v9, %s2953_s17 }
 0xdf3   :  { %v2129_v63 = vpop.xlane.xlu1 %2128 }
 0xdf4   :  { %v2133_v1 = vsub.f32 %v2071_v57, %v2129_v63 }
 0xdf6   :  { %v2135_v2 = vmul.f32 1.442695, %v2133_v1 }
 0xdf7   :  { %v2196_v3 = vpop.permute.xlu1 %2195 }
 0xdf8   :  { %2821 = vpow2.f32 %v2135_v2  ;;  %v2201_v4 = vsel %vm252_vm4, %v2196_v3, 0 }
 0xdf9   :  { %2688 = vmatpush3.bf16.msra.mxu1 %v2201_v4 }
 0xdfa   :  { %2693 = vmatprep.subr.bf16.mxu1 %v2930_v0 }
 0xe02   :  { %v2822_v5 = vpop.eup %2821 }
 0xe03   :  { %v2139_v6 = vsel %vm226_vm3, %v2822_v5, 0.0  ;;  %v2145_v18 = vpack.c.bf16 %v2822_v5, %v2822_v5 }
 0xe04   :  { %2140 = vadd.xlane.f32.xlu1 %v2139_v6 }
 0xe23   :  { %v2121_v7 = vpop.f32.mrb[48].mxu1 }
 0xe24   :  { %v2679_v8 = vpop.f32.mrb[49].mxu1  ;;  %v2130_v10 = vsel %vm226_vm3, %v2121_v7, -inf }
 0xe25   :  { %2131 = vmax.xlane.f32.xlu0 %v2130_v10  ;;  %v2124_v9 = vpop.f32.mrb[50].mxu1 }
 0xe26   :  { %v2680_v12 = vpop.f32.mrb[51].mxu1 }
 0xe3b   :  { %2147 = vrot.lane.b32.xlu0 %v3034_v11, %s2953_s17  ;;  %v2366_v11 = vcombine.low %v3334_v36, %v3334_v36 }
 0xe3d   :  { %v2251_v21 = vrot.slane %v2366_v11, 2 }
 0xe3f   :  { %v2256_v23 = vsel %vm577_vm5, %v2251_v21, 0 }
 0xe91   :  { %v2141_v24 = vpop.xlane.xlu1 %2140 }
 0xeb2   :  { %v2132_v13 = vpop.xlane.xlu0 %2131 }
 0xeb3   :  { %v2134_v14 = vsub.f32 %v2121_v7, %v2132_v13 }
 0xeb5   :  { %v2137_v15 = vmul.f32 1.442695, %v2134_v14 }
 0xeb6   :  { %v2148_v16 = vpop.permute.xlu0 %2147 }
 0xeb7   :  { %2823 = vpow2.f32 %v2137_v15  ;;  %v2153_v17 = vsel %vm252_vm4, %v2148_v16, 0 }
 0xeb8   :  { %2682 = vmatpush3.bf16.msra.mxu0 %v2153_v17  ;;  %2825 = vrcp.f32 %v2141_v24 }
 0xebb   :  { %2684 = vmatmul.mubr.msk.bf16.vlgmr.msra.gmra.mrb[76].mxu0 %vm226_vm3, %v2145_v18 }
 0xec1   :  { %v2824_v19 = vpop.eup %2823 }
 0xec2   :  { %v2142_v60 = vsel %vm226_vm3, %v2824_v19, 0.0  ;;  %v2146_v20 = vpack.c.bf16 %v2824_v19, %v2824_v19  ;;  %v2826_v30 = vpop.eup %2825 }
 0xec3   :  { %2143 = vadd.xlane.f32.xlu0 %v2142_v60 }
 0xec4   :  { %2690 = vmatmul.mubr.msk.bf16.vlgmr.msra.gmra.mrb[52].mxu1 %vm226_vm3, %v2146_v20 }
 0xec5   :  { %2695 = vmatprep.mubr.msk.bf16.mxu1 %vm2931_vm0, %v2930_v0  ;;  %2694 = vmatpush3.bf16.msra.mxu1 %v2256_v23 }
 0xf50   :  { %v2144_v25 = vpop.xlane.xlu0 %2143 }
 0xf51   :  { %2827 = vrcp.f32 %v2144_v25 }
 0xf5b   :  { %v2828_v31 = vpop.eup %2827 }
 0xf8e   :  { %v2189_v26 = vpop.f32.mrb[76].mxu0 }
 0xf8f   :  { %v2685_v27 = vpop.f32.mrb[77].mxu0  ;;  %v2245_v33 = vmul.f32 %v2826_v30, %v2189_v26 }
 0xf90   :  { %v2192_v28 = vpop.f32.mrb[78].mxu0 }
 0xf91   :  { %v2686_v29 = vpop.f32.mrb[79].mxu0 }
 0xf97   :  { %v2237_v32 = vpop.f32.mrb[52].mxu1 }
 0xf98   :  { %v2246_v0 = vmul.f32 %v2828_v31, %v2237_v32  ;;  %v2691_v34 = vpop.f32.mrb[53].mxu1 }
 0xf99   :  { %v2240_v35 = vpop.f32.mrb[54].mxu1 }
 0xf9a   :  { %v2247_v36 = vpack.c.bf16 %v2246_v0, %v2245_v33  ;;  %v2692_v37 = vpop.f32.mrb[55].mxu1 }
 0xf9c   :  { %2696 = vmatmul.mubr.msk.bf16.vlgmr.msra.gmra.mrb[16].mxu1 %vm130_vm2, %v2247_v36 }
0x106f   :  { %v2292_v38 = vpop.f32.mrb[16].mxu1 }
0x1070   :  { %2301 = vst.msk [vmem:[#allocation8] sm:$0xff] %vm80_vm1, %v2292_v38  ;;  %v2697_v39 = vpop.f32.mrb[17].mxu1 }
0x1071   :  { %v2295_v40 = vpop.f32.mrb[18].mxu1 }
0x1072   :  { %2302 = vst.msk [vmem:[#allocation8 + $0x8] sm:$0xff] %vm80_vm1, %v2295_v40  ;;  %v2698_v22 = vpop.f32.mrb[19].mxu1 }
0x1073   :  { %2906 = shalt.err (!%p2903_p0)
}
0x1074   :  { %s2907_s24 = scalar_lea.hbm %s3390_s3, 256 }
0x1075   :  { %p2908_p1 = scmp.ne.s32.totalorder %s3390_s3, %s2907_s24  ;;  %p2911_p2 = scmp.lt.u32.totalorder %s2907_s24, %s3390_s3 }
0x1077   :  { %p2913_p3 = pnand %p2911_p2, %p2908_p1 }
0x1079   :  { %2916 = shalt.err (!%p2913_p3)
}
0x107a   :  { %2314 = dma.vmem_to_hbm [thread:$0]  %s2309_s19, 256, %s3390_s3, [#allocation4], %s2927_s1, %s2927_s1, %s2928_s9  }
0x107b   :  { %2921 = dma.done.wait [#allocation4], 256  }
0x107c   :  { %2922 = vsyncadd [#allocation4], 4294967040 }
0x107d   :  { %2318 = vsyncpa [#allocation3], 1 }
0x107e   :  { %2319 = vsyncpa [#allocation6], 1 }
0x107f   :  { %2320 = vsyncpa [#allocation4], 1 }

</bundles_post_ra>
